<compile_context>
chip_gen: v6e
topology: v6e:2x2x1
jax: 0.10.0
libtpu: 0.0.40
codegen_flags: <defaults>
</compile_context>

<pallas_src>
import functools

import numpy as np

import jax
import jax.numpy as jnp
from jax import lax
from jax.experimental import pallas as pl
from jax.experimental.pallas import tpu as pltpu


# ----------------------------- small "hp" config ------------------------------
class hp:
    n_mels = 16                 # mel channels of the style spectrogram
    ref_enc_filters = [4, 8]    # K = 2 conv layers
    E = 32                      # style embedding dim
    num_heads = 4
    token_num = 8


VMEM_SPEC = pl.BlockSpec(memory_space=pltpu.MemorySpace.VMEM)


def _conv_out(L):
    return (L - 3 + 2) // 2 + 1


# ------------------------------ fused Pallas kernel ---------------------------
def gst_fused_kernel(x_ref, p_ref, o_ref, *, dims, layout):
    N, Npad = dims["N"], dims["Npad"]
    W1 = dims["W1"]
    Ho1, Wo1 = dims["Ho1"], dims["Wo1"]
    Ho2, Wo2 = dims["Ho2"], dims["Wo2"]
    C1 = dims["C1"]
    Hh = dims["Hh"]
    f32 = jnp.float32

    def P(name):  # static view into the single packed parameter buffer
        off, r, c = layout[name]
        return p_ref[off:off + r, 0:c]

    def dot(a, b):
        return jnp.dot(a, b, preferred_element_type=f32)

    def sigm(v):  # exact sigmoid routed through the EUP tanh
        return 0.5 * (jnp.tanh(0.5 * v) + 1.0)

    # ---- conv1 (3x3, s2, p1): selection matmul + 3 fused per-kh weight matmuls ----
    a1 = dot(P("la1"), x_ref[...])                    # rows (kh, n, ho1), cols w
    rw1 = P("rw1")                                    # [3*W1, C1*Wo1]
    r1 = N * Ho1
    y1 = dot(a1[0:r1], rw1[0:W1])
    y1 = y1 + dot(a1[r1:2 * r1], rw1[W1:2 * W1])
    y1 = y1 + dot(a1[2 * r1:3 * r1], rw1[2 * W1:3 * W1])
    # BatchNorm (batch stats -> conv bias cancels exactly) + ReLU; one fused stat matmul
    stats1 = jnp.concatenate([jnp.sum(y1, axis=0, keepdims=True),
                              jnp.sum(y1 * y1, axis=0, keepdims=True)], axis=0)
    mq1 = dot(stats1, P("bs1")) * (1.0 / float(N * Ho1 * Wo1))
    m1, q1 = mq1[0:1, :], mq1[1:2, :]
    y1 = (y1 - m1) * (lax.rsqrt(q1 - m1 * m1 + 1e-5) * P("gam1")) + P("bet1")
    y1 = jnp.maximum(y1, 0.0)                         # [(n,ho1), (c1,wo1)]

    # ---- conv2: time-major (t, n_pad8) rows; channel loop folded into contraction ----
    g2 = dot(P("la2"), y1)                            # [3*Ho2*Npad, C1*Wo1]
    rw2 = P("rw2")                                    # [3*C1*Wo1, C2*Wo2]
    r2 = Ho2 * Npad
    cW = C1 * Wo1
    y2 = dot(g2[0:r2], rw2[0:cW])
    y2 = y2 + dot(g2[r2:2 * r2], rw2[cW:2 * cW])
    y2 = y2 + dot(g2[2 * r2:3 * r2], rw2[2 * cW:3 * cW])
    # padded batch rows are exactly zero here, so batch statistics are unaffected
    stats2 = jnp.concatenate([jnp.sum(y2, axis=0, keepdims=True),
                              jnp.sum(y2 * y2, axis=0, keepdims=True)], axis=0)
    mq2 = dot(stats2, P("bs2")) * (1.0 / float(N * Ho2 * Wo2))
    m2, q2 = mq2[0:1, :], mq2[1:2, :]
    y2 = (y2 - m2) * (lax.rsqrt(q2 - m2 * m2 + 1e-5) * P("gam2")) + P("bet2")
    y2 = jnp.maximum(y2, 0.0)                         # rows (t, n_pad8), cols = GRU feats

    # ---- GRU: single hoisted input projection, one recurrent matmul per step ----
    gi = dot(y2, P("wih")) + P("bih")                 # [T*Npad, 3*Hh], gate order (r,z,n)
    whh, bhh = P("whh"), P("bhh")
    h = jnp.zeros((Npad, Hh), f32)
    for t in range(Ho2):                              # T = Ho2, static unroll
        gh = dot(h, whh) + bhh                        # [Npad, 3*Hh]
        gt = gi[t * Npad:(t + 1) * Npad, :]           # aligned 8-sublane block
        r = sigm(gt[:, 0:Hh] + gh[:, 0:Hh])
        z = sigm(gt[:, Hh:2 * Hh] + gh[:, Hh:2 * Hh])
        n = jnp.tanh(gt[:, 2 * Hh:3 * Hh] + r * gh[:, 2 * Hh:3 * Hh])
        h = (1.0 - z) * n + z * h

    # ---- STL multi-head attention: all heads at once (block-diag K / V) ----
    q = dot(h, P("wq"))                               # [Npad, E]
    s = dot(q, P("kblk"))                             # per-head scores, scale folded in
    e = jnp.exp(s - jnp.max(s, axis=-1, keepdims=True))   # row-constant shift: per-head softmax unchanged
    den = dot(e, P("bsa"))                            # per-head denominators via block-ones matmul
    p = e * pl.reciprocal(den, approx=True)           # EUP reciprocal
    o_ref[...] = dot(p, P("vblk"))                    # [Npad, E]; padded rows dropped by wrapper


# -------------------- one-time parameter / constant preparation ---------------
def prepare_params(params, N, frames):
    H1, W1 = frames, hp.n_mels
    Ho1, Wo1 = _conv_out(H1), _conv_out(W1)
    Ho2, Wo2 = _conv_out(Ho1), _conv_out(Wo1)
    C1, C2 = hp.ref_enc_filters
    E, nh, tok = hp.E, hp.num_heads, hp.token_num
    dh = E // nh
    Hh = E // 2
    Npad = ((N + 7) // 8) * 8                         # pad batch rows to a sublane block

    (w1, _b1, gamma1, beta1), (w2, _b2, gamma2, beta2) = params["convs"]
    w1, gamma1, beta1 = map(np.asarray, (w1, gamma1, beta1))
    w2, gamma2, beta2 = map(np.asarray, (w2, gamma2, beta2))
    # conv biases dropped: BatchNorm with batch statistics cancels them exactly.

    # conv1 selection (rows (kh, n, ho1)) + fused right weights rw1[kh] (= rb1 @ wt1[kh])
    la1 = np.zeros((3 * N * Ho1, N * H1), np.float32)
    for kh in range(3):
        for n in range(N):
            for ho in range(Ho1):
                hh = 2 * ho + kh - 1
                if 0 <= hh < H1:
                    la1[kh * N * Ho1 + n * Ho1 + ho, n * H1 + hh] = 1.0
    rw1 = np.zeros((3 * W1, C1 * Wo1), np.float32)
    for kh in range(3):
        for kw in range(3):
            for wo in range(Wo1):
                ww = 2 * wo + kw - 1
                if 0 <= ww < W1:
                    for co in range(C1):
                        rw1[kh * W1 + ww, co * Wo1 + wo] += float(w1[co, 0, kh, kw])

    # conv2 selection: rows time-major (kh, ho2, n_pad8) -> GRU-ready layout;
    # fused right weights stack the input-channel loop into the contraction dim.
    la2 = np.zeros((3 * Ho2 * Npad, N * Ho1), np.float32)
    for kh in range(3):
        for t in range(Ho2):
            hh = 2 * t + kh - 1
            if 0 <= hh < Ho1:
                for n in range(N):
                    la2[kh * Ho2 * Npad + t * Npad + n, n * Ho1 + hh] = 1.0
    rw2 = np.zeros((3 * C1 * Wo1, C2 * Wo2), np.float32)
    for kh in range(3):
        for ci in range(C1):
            for kw in range(3):
                for wo in range(Wo2):
                    wi = 2 * wo + kw - 1
                    if 0 <= wi < Wo1:
                        for co in range(C2):
                            rw2[kh * C1 * Wo1 + ci * Wo1 + wi, co * Wo2 + wo] += \
                                float(w2[co, ci, kh, kw])

    bs1 = np.kron(np.eye(C1, dtype=np.float32), np.ones((Wo1, Wo1), np.float32))
    bs2 = np.kron(np.eye(C2, dtype=np.float32), np.ones((Wo2, Wo2), np.float32))
    gam1 = np.repeat(gamma1, Wo1)[None, :].astype(np.float32)
    bet1 = np.repeat(beta1, Wo1)[None, :].astype(np.float32)
    gam2 = np.repeat(gamma2, Wo2)[None, :].astype(np.float32)
    bet2 = np.repeat(beta2, Wo2)[None, :].astype(np.float32)

    wih, whh, bih, bhh = [np.asarray(a) for a in params["gru"]]
    wih_all = wih.T.astype(np.float32)                # [F, 3*Hh], gate order (r, z, n)
    whh_all = whh.T.astype(np.float32)                # [Hh, 3*Hh]
    bih_all = bih[None, :].astype(np.float32)
    bhh_all = bhh[None, :].astype(np.float32)

    embed, wq, wk, wv = [np.asarray(a) for a in params["stl"]]
    keys = np.tanh(embed)                             # [tok, d_k]
    K = keys @ wk.T                                   # [tok, E]
    V = keys @ wv.T                                   # [tok, E]
    key_dim = E // nh
    kblk = np.zeros((E, nh * tok), np.float32)        # block-diag K^T (per head), scale folded
    vblk = np.zeros((nh * tok, E), np.float32)        # block-diag V (per head)
    for h in range(nh):
        kblk[h * dh:(h + 1) * dh, h * tok:(h + 1) * tok] = \
            K[:, h * dh:(h + 1) * dh].T / np.sqrt(key_dim)
        vblk[h * tok:(h + 1) * tok, h * dh:(h + 1) * dh] = V[:, h * dh:(h + 1) * dh]
    bsa = np.kron(np.eye(nh, dtype=np.float32), np.ones((tok, tok), np.float32))
    wq_t = wq.T.astype(np.float32)                    # [d_q, E]

    # ---- pack everything into ONE (8,128)-aligned buffer (single HBM->VMEM DMA) ----
    entries = [("la1", la1), ("rw1", rw1), ("bs1", bs1), ("gam1", gam1), ("bet1", bet1),
               ("la2", la2), ("rw2", rw2), ("bs2", bs2), ("gam2", gam2), ("bet2", bet2),
               ("wih", wih_all), ("bih", bih_all), ("whh", whh_all), ("bhh", bhh_all),
               ("wq", wq_t), ("kblk", kblk), ("vblk", vblk), ("bsa", bsa)]
    layout = {}
    off = 0
    for name, a in entries:
        r, c = a.shape
        layout[name] = (off, r, c)
        off += ((r + 7) // 8) * 8                     # 8-sublane aligned row offsets
    packed = np.zeros((max(off, 8), 128), np.float32)
    for name, a in entries:
        o, r, c = layout[name]
        packed[o:o + r, :c] = a

    dims = dict(N=N, Npad=Npad, frames=frames, mels=hp.n_mels, W1=W1,
                Ho1=Ho1, Wo1=Wo1, Ho2=Ho2, Wo2=Wo2, C1=C1, C2=C2, Hh=Hh, E=E)
    return dims, layout, jnp.asarray(packed)


# ------------------------------ forward wrapper --------------------------------
def make_forward(dims, layout):
    N, Npad = dims["N"], dims["Npad"]
    frames, mels, E = dims["frames"], dims["mels"], dims["E"]
    kernel = functools.partial(gst_fused_kernel, dims=dims, layout=layout)

    @jax.jit
    def forward(packed, inputs):
        """inputs: [N, num_spec_frames, n_mels] -> style embedding [N, 1, E]."""
        x = inputs.reshape(N * frames, mels)          # rows (n, h), cols w
        out = pl.pallas_call(
            kernel,
            out_shape=jax.ShapeDtypeStruct((Npad, E), jnp.float32),
            in_specs=[VMEM_SPEC, VMEM_SPEC],
            out_specs=VMEM_SPEC,
        )(x, packed)
        return out[:N].reshape(N, 1, E)               # drop padded batch rows

    return forward


# ----------------------- pure-JAX reference for checking ----------------------
def reference_forward(params, inputs):
    N = inputs.shape[0]
    x = inputs.reshape(N, 1, -1, hp.n_mels)
    for (w, b, gamma, beta) in params["convs"]:
        y = lax.conv_general_dilated(x, w, (2, 2), ((1, 1), (1, 1)),
                                     dimension_numbers=("NCHW", "OIHW", "NCHW"))
        y = y + b.reshape(1, -1, 1, 1)
        mu = jnp.mean(y, axis=(0, 2, 3), keepdims=True)
        var = jnp.mean((y - mu) ** 2, axis=(0, 2, 3), keepdims=True)
        y = (y - mu) / jnp.sqrt(var + 1e-5) * gamma.reshape(1, -1, 1, 1) + beta.reshape(1, -1, 1, 1)
        x = jnp.maximum(y, 0.0)
    _, C, Tp, M = x.shape
    seq = jnp.transpose(x, (0, 2, 1, 3)).reshape(N, Tp, C * M)

    wih, whh, bih, bhh = params["gru"]
    H = hp.E // 2

    def step(h, x_t):
        gi = x_t @ wih.T + bih
        gh = h @ whh.T + bhh
        r = jax.nn.sigmoid(gi[:, :H] + gh[:, :H])
        z = jax.nn.sigmoid(gi[:, H:2 * H] + gh[:, H:2 * H])
        n = jnp.tanh(gi[:, 2 * H:] + r * gh[:, 2 * H:])
        return (1 - z) * n + z * h, None

    h, _ = lax.scan(step, jnp.zeros((N, H), jnp.float32), jnp.transpose(seq, (1, 0, 2)))

    embed, wq, wk, wv = params["stl"]
    keys = jnp.tanh(embed)
    Q, K, V = h @ wq.T, keys @ wk.T, keys @ wv.T
    dh = hp.E // hp.num_heads
    key_dim = hp.E // hp.num_heads
    outs = []
    for i in range(hp.num_heads):
        s = (Q[:, i * dh:(i + 1) * dh] @ K[:, i * dh:(i + 1) * dh].T) / key_dim ** 0.5
        p = jax.nn.softmax(s, axis=-1)
        outs.append(p @ V[:, i * dh:(i + 1) * dh])
    return jnp.concatenate(outs, axis=-1).reshape(N, 1, hp.E)


# -------------------------- deterministic parameters ---------------------------
def init_params(key):
    keys = jax.random.split(key, 16)
    ki = 0
    params = {"convs": []}
    filters = [1] + hp.ref_enc_filters
    for i in range(len(hp.ref_enc_filters)):
        cin, cout = filters[i], filters[i + 1]
        w = 0.1 * jax.random.normal(keys[ki], (cout, cin, 3, 3), jnp.float32); ki += 1
        b = 0.1 * jax.random.normal(keys[ki], (cout,), jnp.float32); ki += 1
        params["convs"].append((w, b, jnp.ones((cout,), jnp.float32),
                                jnp.zeros((cout,), jnp.float32)))
    out_ch = hp.n_mels
    for _ in range(len(hp.ref_enc_filters)):
        out_ch = _conv_out(out_ch)
    F = hp.ref_enc_filters[-1] * out_ch
    H = hp.E // 2
    wih = 0.1 * jax.random.normal(keys[ki], (3 * H, F), jnp.float32); ki += 1
    whh = 0.1 * jax.random.normal(keys[ki], (3 * H, H), jnp.float32); ki += 1
    bih = 0.1 * jax.random.normal(keys[ki], (3 * H,), jnp.float32); ki += 1
    bhh = 0.1 * jax.random.normal(keys[ki], (3 * H,), jnp.float32); ki += 1
    params["gru"] = (wih, whh, bih, bhh)
    d_q = hp.E // 2
    d_k = hp.E // hp.num_heads
    embed = 0.5 * jax.random.normal(keys[ki], (hp.token_num, d_k), jnp.float32); ki += 1
    wq = 0.1 * jax.random.normal(keys[ki], (hp.E, d_q), jnp.float32); ki += 1
    wk = 0.1 * jax.random.normal(keys[ki], (hp.E, d_k), jnp.float32); ki += 1
    wv = 0.1 * jax.random.normal(keys[ki], (hp.E, d_k), jnp.float32); ki += 1
    params["stl"] = (embed, wq, wk, wv)
    return params


if __name__ == "__main__":
    key = jax.random.PRNGKey(0)
    pkey, xkey = jax.random.split(key)
    params = init_params(pkey)

    # style mel spectrogram: [batch, num_spec_frames, n_mels]
    inputs = jax.random.normal(xkey, (2, 16, hp.n_mels), jnp.float32)

    dims, layout, packed = prepare_params(params, N=inputs.shape[0], frames=inputs.shape[1])
    forward = make_forward(dims, layout)

    out = jax.block_until_ready(forward(packed, inputs))
    ref = jax.block_until_ready(reference_forward(params, inputs))

    assert out.shape == (2, 1, hp.E), out.shape
    assert bool(jnp.all(jnp.isfinite(out)))
    # tolerance accounts for the approximate EUP reciprocal in the softmax normalization
    assert bool(jnp.allclose(out, ref, rtol=1e-3, atol=1e-3)), (
        float(jnp.max(jnp.abs(out - ref))))
    print("KERNEL_OK")
</pallas_src>

<mosaic_0001>
module attributes {stable_mosaic.version = 11 : i64} {
  func.func @gst_fused_kernel(%arg0: memref<32x16xf32, #tpu.memory_space<vmem>>, %arg1: memref<560x128xf32, #tpu.memory_space<vmem>>, %arg2: memref<8x32xf32, #tpu.memory_space<vmem>>) attributes {dimension_semantics = [], scalar_prefetch = 0 : i64, scratch_operands = 0 : i64, tpu.core_type = #tpu.core_type<tc>} {
    %c0 = arith.constant 0 : index
    %c0_0 = arith.constant 0 : index
    %0 = vector.load %arg1[%c0, %c0_0] : memref<560x128xf32, #tpu.memory_space<vmem>>, vector<48x32xf32>
    %c0_1 = arith.constant 0 : index
    %c0_2 = arith.constant 0 : index
    %1 = vector.load %arg0[%c0_1, %c0_2] : memref<32x16xf32, #tpu.memory_space<vmem>>, vector<32x16xf32>
    %cst = arith.constant dense<0.000000e+00> : vector<48x16xf32>
    %2 = tpu.matmul %0, %1, %cst {dimension_numbers = #tpu.dot_dimension_numbers<[1], [0], [0], [1], [0, 0, 1, 1], [], []>} : vector<48x32xf32>, vector<32x16xf32>, vector<48x16xf32> -> vector<48x16xf32>
    %c48 = arith.constant 48 : index
    %c0_3 = arith.constant 0 : index
    %3 = vector.load %arg1[%c48, %c0_3] : memref<560x128xf32, #tpu.memory_space<vmem>>, vector<48x32xf32>
    %4 = vector.extract_strided_slice %2 {offsets = [0, 0], sizes = [16, 16], strides = [1, 1]} : vector<48x16xf32> to vector<16x16xf32>
    %5 = vector.extract_strided_slice %3 {offsets = [0, 0], sizes = [16, 32], strides = [1, 1]} : vector<48x32xf32> to vector<16x32xf32>
    %cst_4 = arith.constant dense<0.000000e+00> : vector<16x32xf32>
    %6 = tpu.matmul %4, %5, %cst_4 {dimension_numbers = #tpu.dot_dimension_numbers<[1], [0], [0], [1], [0, 0, 1, 1], [], []>} : vector<16x16xf32>, vector<16x32xf32>, vector<16x32xf32> -> vector<16x32xf32>
    %7 = vector.extract_strided_slice %2 {offsets = [16, 0], sizes = [16, 16], strides = [1, 1]} : vector<48x16xf32> to vector<16x16xf32>
    %8 = vector.extract_strided_slice %3 {offsets = [16, 0], sizes = [16, 32], strides = [1, 1]} : vector<48x32xf32> to vector<16x32xf32>
    %cst_5 = arith.constant dense<0.000000e+00> : vector<16x32xf32>
    %9 = tpu.matmul %7, %8, %cst_5 {dimension_numbers = #tpu.dot_dimension_numbers<[1], [0], [0], [1], [0, 0, 1, 1], [], []>} : vector<16x16xf32>, vector<16x32xf32>, vector<16x32xf32> -> vector<16x32xf32>
    %10 = arith.addf %6, %9 : vector<16x32xf32>
    %11 = vector.extract_strided_slice %2 {offsets = [32, 0], sizes = [16, 16], strides = [1, 1]} : vector<48x16xf32> to vector<16x16xf32>
    %12 = vector.extract_strided_slice %3 {offsets = [32, 0], sizes = [16, 32], strides = [1, 1]} : vector<48x32xf32> to vector<16x32xf32>
    %cst_6 = arith.constant dense<0.000000e+00> : vector<16x32xf32>
    %13 = tpu.matmul %11, %12, %cst_6 {dimension_numbers = #tpu.dot_dimension_numbers<[1], [0], [0], [1], [0, 0, 1, 1], [], []>} : vector<16x16xf32>, vector<16x32xf32>, vector<16x32xf32> -> vector<16x32xf32>
    %14 = arith.addf %10, %13 : vector<16x32xf32>
    %cst_7 = arith.constant dense<0.000000e+00> : vector<32xf32>
    %15 = vector.multi_reduction <add>, %14, %cst_7 [0] : vector<16x32xf32> to vector<32xf32>
    %16 = vector.shape_cast %15 : vector<32xf32> to vector<1x32xf32>
    %17 = arith.mulf %14, %14 : vector<16x32xf32>
    %cst_8 = arith.constant dense<0.000000e+00> : vector<32xf32>
    %18 = vector.multi_reduction <add>, %17, %cst_8 [0] : vector<16x32xf32> to vector<32xf32>
    %19 = vector.shape_cast %18 : vector<32xf32> to vector<1x32xf32>
    %20 = tpu.concatenate %16, %19 in 0 : vector<1x32xf32>, vector<1x32xf32> -> vector<2x32xf32>
    %c96 = arith.constant 96 : index
    %c0_9 = arith.constant 0 : index
    %21 = vector.load %arg1[%c96, %c0_9] : memref<560x128xf32, #tpu.memory_space<vmem>>, vector<32x32xf32>
    %cst_10 = arith.constant dense<0.000000e+00> : vector<2x32xf32>
    %22 = tpu.matmul %20, %21, %cst_10 {dimension_numbers = #tpu.dot_dimension_numbers<[1], [0], [0], [1], [0, 0, 1, 1], [], []>} : vector<2x32xf32>, vector<32x32xf32>, vector<2x32xf32> -> vector<2x32xf32>
    %cst_11 = arith.constant 7.812500e-03 : f32
    %23 = vector.broadcast %cst_11 : f32 to vector<2x32xf32>
    %24 = arith.mulf %22, %23 : vector<2x32xf32>
    %25 = vector.extract_strided_slice %24 {offsets = [0, 0], sizes = [1, 32], strides = [1, 1]} : vector<2x32xf32> to vector<1x32xf32>
    %26 = vector.extract_strided_slice %24 {offsets = [1, 0], sizes = [1, 32], strides = [1, 1]} : vector<2x32xf32> to vector<1x32xf32>
    %27 = vector.broadcast %25 : vector<1x32xf32> to vector<16x32xf32>
    %28 = arith.subf %14, %27 : vector<16x32xf32>
    %29 = arith.mulf %25, %25 : vector<1x32xf32>
    %30 = arith.subf %26, %29 : vector<1x32xf32>
    %cst_12 = arith.constant 9.99999974E-6 : f32
    %31 = vector.broadcast %cst_12 : f32 to vector<1x32xf32>
    %32 = arith.addf %30, %31 : vector<1x32xf32>
    %33 = math.rsqrt %32 : vector<1x32xf32>
    %c128 = arith.constant 128 : index
    %c0_13 = arith.constant 0 : index
    %34 = vector.load %arg1[%c128, %c0_13] : memref<560x128xf32, #tpu.memory_space<vmem>>, vector<1x32xf32>
    %35 = arith.mulf %33, %34 : vector<1x32xf32>
    %36 = vector.broadcast %35 : vector<1x32xf32> to vector<16x32xf32>
    %37 = arith.mulf %28, %36 : vector<16x32xf32>
    %c136 = arith.constant 136 : index
    %c0_14 = arith.constant 0 : index
    %38 = vector.load %arg1[%c136, %c0_14] : memref<560x128xf32, #tpu.memory_space<vmem>>, vector<1x32xf32>
    %39 = vector.broadcast %38 : vector<1x32xf32> to vector<16x32xf32>
    %40 = arith.addf %37, %39 : vector<16x32xf32>
    %cst_15 = arith.constant 0.000000e+00 : f32
    %41 = vector.broadcast %cst_15 : f32 to vector<16x32xf32>
    %42 = arith.maximumf %40, %41 : vector<16x32xf32>
    %c144 = arith.constant 144 : index
    %c0_16 = arith.constant 0 : index
    %43 = vector.load %arg1[%c144, %c0_16] : memref<560x128xf32, #tpu.memory_space<vmem>>, vector<96x16xf32>
    %cst_17 = arith.constant dense<0.000000e+00> : vector<96x32xf32>
    %44 = tpu.matmul %43, %42, %cst_17 {dimension_numbers = #tpu.dot_dimension_numbers<[1], [0], [0], [1], [0, 0, 1, 1], [], []>} : vector<96x16xf32>, vector<16x32xf32>, vector<96x32xf32> -> vector<96x32xf32>
    %c240 = arith.constant 240 : index
    %c0_18 = arith.constant 0 : index
    %45 = vector.load %arg1[%c240, %c0_18] : memref<560x128xf32, #tpu.memory_space<vmem>>, vector<96x32xf32>
    %46 = vector.extract_strided_slice %44 {offsets = [0, 0], sizes = [32, 32], strides = [1, 1]} : vector<96x32xf32> to vector<32x32xf32>
    %47 = vector.extract_strided_slice %45 {offsets = [0, 0], sizes = [32, 32], strides = [1, 1]} : vector<96x32xf32> to vector<32x32xf32>
    %cst_19 = arith.constant dense<0.000000e+00> : vector<32x32xf32>
    %48 = tpu.matmul %46, %47, %cst_19 {dimension_numbers = #tpu.dot_dimension_numbers<[1], [0], [0], [1], [0, 0, 1, 1], [], []>} : vector<32x32xf32>, vector<32x32xf32>, vector<32x32xf32> -> vector<32x32xf32>
    %49 = vector.extract_strided_slice %44 {offsets = [32, 0], sizes = [32, 32], strides = [1, 1]} : vector<96x32xf32> to vector<32x32xf32>
    %50 = vector.extract_strided_slice %45 {offsets = [32, 0], sizes = [32, 32], strides = [1, 1]} : vector<96x32xf32> to vector<32x32xf32>
    %cst_20 = arith.constant dense<0.000000e+00> : vector<32x32xf32>
    %51 = tpu.matmul %49, %50, %cst_20 {dimension_numbers = #tpu.dot_dimension_numbers<[1], [0], [0], [1], [0, 0, 1, 1], [], []>} : vector<32x32xf32>, vector<32x32xf32>, vector<32x32xf32> -> vector<32x32xf32>
    %52 = arith.addf %48, %51 : vector<32x32xf32>
    %53 = vector.extract_strided_slice %44 {offsets = [64, 0], sizes = [32, 32], strides = [1, 1]} : vector<96x32xf32> to vector<32x32xf32>
    %54 = vector.extract_strided_slice %45 {offsets = [64, 0], sizes = [32, 32], strides = [1, 1]} : vector<96x32xf32> to vector<32x32xf32>
    %cst_21 = arith.constant dense<0.000000e+00> : vector<32x32xf32>
    %55 = tpu.matmul %53, %54, %cst_21 {dimension_numbers = #tpu.dot_dimension_numbers<[1], [0], [0], [1], [0, 0, 1, 1], [], []>} : vector<32x32xf32>, vector<32x32xf32>, vector<32x32xf32> -> vector<32x32xf32>
    %56 = arith.addf %52, %55 : vector<32x32xf32>
    %cst_22 = arith.constant dense<0.000000e+00> : vector<32xf32>
    %57 = vector.multi_reduction <add>, %56, %cst_22 [0] : vector<32x32xf32> to vector<32xf32>
    %58 = vector.shape_cast %57 : vector<32xf32> to vector<1x32xf32>
    %59 = arith.mulf %56, %56 : vector<32x32xf32>
    %cst_23 = arith.constant dense<0.000000e+00> : vector<32xf32>
    %60 = vector.multi_reduction <add>, %59, %cst_23 [0] : vector<32x32xf32> to vector<32xf32>
    %61 = vector.shape_cast %60 : vector<32xf32> to vector<1x32xf32>
    %62 = tpu.concatenate %58, %61 in 0 : vector<1x32xf32>, vector<1x32xf32> -> vector<2x32xf32>
    %c336 = arith.constant 336 : index
    %c0_24 = arith.constant 0 : index
    %63 = vector.load %arg1[%c336, %c0_24] : memref<560x128xf32, #tpu.memory_space<vmem>>, vector<32x32xf32>
    %cst_25 = arith.constant dense<0.000000e+00> : vector<2x32xf32>
    %64 = tpu.matmul %62, %63, %cst_25 {dimension_numbers = #tpu.dot_dimension_numbers<[1], [0], [0], [1], [0, 0, 1, 1], [], []>} : vector<2x32xf32>, vector<32x32xf32>, vector<2x32xf32> -> vector<2x32xf32>
    %cst_26 = arith.constant 3.125000e-02 : f32
    %65 = vector.broadcast %cst_26 : f32 to vector<2x32xf32>
    %66 = arith.mulf %64, %65 : vector<2x32xf32>
    %67 = vector.extract_strided_slice %66 {offsets = [0, 0], sizes = [1, 32], strides = [1, 1]} : vector<2x32xf32> to vector<1x32xf32>
    %68 = vector.extract_strided_slice %66 {offsets = [1, 0], sizes = [1, 32], strides = [1, 1]} : vector<2x32xf32> to vector<1x32xf32>
    %69 = vector.broadcast %67 : vector<1x32xf32> to vector<32x32xf32>
    %70 = arith.subf %56, %69 : vector<32x32xf32>
    %71 = arith.mulf %67, %67 : vector<1x32xf32>
    %72 = arith.subf %68, %71 : vector<1x32xf32>
    %cst_27 = arith.constant 9.99999974E-6 : f32
    %73 = vector.broadcast %cst_27 : f32 to vector<1x32xf32>
    %74 = arith.addf %72, %73 : vector<1x32xf32>
    %75 = math.rsqrt %74 : vector<1x32xf32>
    %c368 = arith.constant 368 : index
    %c0_28 = arith.constant 0 : index
    %76 = vector.load %arg1[%c368, %c0_28] : memref<560x128xf32, #tpu.memory_space<vmem>>, vector<1x32xf32>
    %77 = arith.mulf %75, %76 : vector<1x32xf32>
    %78 = vector.broadcast %77 : vector<1x32xf32> to vector<32x32xf32>
    %79 = arith.mulf %70, %78 : vector<32x32xf32>
    %c376 = arith.constant 376 : index
    %c0_29 = arith.constant 0 : index
    %80 = vector.load %arg1[%c376, %c0_29] : memref<560x128xf32, #tpu.memory_space<vmem>>, vector<1x32xf32>
    %81 = vector.broadcast %80 : vector<1x32xf32> to vector<32x32xf32>
    %82 = arith.addf %79, %81 : vector<32x32xf32>
    %cst_30 = arith.constant 0.000000e+00 : f32
    %83 = vector.broadcast %cst_30 : f32 to vector<32x32xf32>
    %84 = arith.maximumf %82, %83 : vector<32x32xf32>
    %c384 = arith.constant 384 : index
    %c0_31 = arith.constant 0 : index
    %85 = vector.load %arg1[%c384, %c0_31] : memref<560x128xf32, #tpu.memory_space<vmem>>, vector<32x48xf32>
    %cst_32 = arith.constant dense<0.000000e+00> : vector<32x48xf32>
    %86 = tpu.matmul %84, %85, %cst_32 {dimension_numbers = #tpu.dot_dimension_numbers<[1], [0], [0], [1], [0, 0, 1, 1], [], []>} : vector<32x32xf32>, vector<32x48xf32>, vector<32x48xf32> -> vector<32x48xf32>
    %c416 = arith.constant 416 : index
    %c0_33 = arith.constant 0 : index
    %87 = vector.load %arg1[%c416, %c0_33] : memref<560x128xf32, #tpu.memory_space<vmem>>, vector<1x48xf32>
    %88 = vector.broadcast %87 : vector<1x48xf32> to vector<32x48xf32>
    %89 = arith.addf %86, %88 : vector<32x48xf32>
    %c424 = arith.constant 424 : index
    %c0_34 = arith.constant 0 : index
    %90 = vector.load %arg1[%c424, %c0_34] : memref<560x128xf32, #tpu.memory_space<vmem>>, vector<16x48xf32>
    %c440 = arith.constant 440 : index
    %c0_35 = arith.constant 0 : index
    %91 = vector.load %arg1[%c440, %c0_35] : memref<560x128xf32, #tpu.memory_space<vmem>>, vector<1x48xf32>
    %cst_36 = arith.constant 0.000000e+00 : f32
    %92 = vector.broadcast %cst_36 : f32 to vector<8x16xf32>
    %cst_37 = arith.constant dense<0.000000e+00> : vector<8x48xf32>
    %93 = tpu.matmul %92, %90, %cst_37 {dimension_numbers = #tpu.dot_dimension_numbers<[1], [0], [0], [1], [0, 0, 1, 1], [], []>} : vector<8x16xf32>, vector<16x48xf32>, vector<8x48xf32> -> vector<8x48xf32>
    %94 = vector.broadcast %91 : vector<1x48xf32> to vector<8x48xf32>
    %95 = arith.addf %93, %94 : vector<8x48xf32>
    %96 = vector.extract_strided_slice %89 {offsets = [0, 0], sizes = [8, 48], strides = [1, 1]} : vector<32x48xf32> to vector<8x48xf32>
    %97 = vector.extract_strided_slice %96 {offsets = [0, 0], sizes = [8, 16], strides = [1, 1]} : vector<8x48xf32> to vector<8x16xf32>
    %98 = vector.extract_strided_slice %95 {offsets = [0, 0], sizes = [8, 16], strides = [1, 1]} : vector<8x48xf32> to vector<8x16xf32>
    %99 = arith.addf %97, %98 : vector<8x16xf32>
    %cst_38 = arith.constant 5.000000e-01 : f32
    %100 = vector.broadcast %cst_38 : f32 to vector<8x16xf32>
    %101 = arith.mulf %100, %99 : vector<8x16xf32>
    %102 = math.tanh %101 : vector<8x16xf32>
    %cst_39 = arith.constant 1.000000e+00 : f32
    %103 = vector.broadcast %cst_39 : f32 to vector<8x16xf32>
    %104 = arith.addf %102, %103 : vector<8x16xf32>
    %cst_40 = arith.constant 5.000000e-01 : f32
    %105 = vector.broadcast %cst_40 : f32 to vector<8x16xf32>
    %106 = arith.mulf %105, %104 : vector<8x16xf32>
    %107 = vector.extract_strided_slice %96 {offsets = [0, 16], sizes = [8, 16], strides = [1, 1]} : vector<8x48xf32> to vector<8x16xf32>
    %108 = vector.extract_strided_slice %95 {offsets = [0, 16], sizes = [8, 16], strides = [1, 1]} : vector<8x48xf32> to vector<8x16xf32>
    %109 = arith.addf %107, %108 : vector<8x16xf32>
    %cst_41 = arith.constant 5.000000e-01 : f32
    %110 = vector.broadcast %cst_41 : f32 to vector<8x16xf32>
    %111 = arith.mulf %110, %109 : vector<8x16xf32>
    %112 = math.tanh %111 : vector<8x16xf32>
    %cst_42 = arith.constant 1.000000e+00 : f32
    %113 = vector.broadcast %cst_42 : f32 to vector<8x16xf32>
    %114 = arith.addf %112, %113 : vector<8x16xf32>
    %cst_43 = arith.constant 5.000000e-01 : f32
    %115 = vector.broadcast %cst_43 : f32 to vector<8x16xf32>
    %116 = arith.mulf %115, %114 : vector<8x16xf32>
    %117 = vector.extract_strided_slice %96 {offsets = [0, 32], sizes = [8, 16], strides = [1, 1]} : vector<8x48xf32> to vector<8x16xf32>
    %118 = vector.extract_strided_slice %95 {offsets = [0, 32], sizes = [8, 16], strides = [1, 1]} : vector<8x48xf32> to vector<8x16xf32>
    %119 = arith.mulf %106, %118 : vector<8x16xf32>
    %120 = arith.addf %117, %119 : vector<8x16xf32>
    %121 = math.tanh %120 : vector<8x16xf32>
    %cst_44 = arith.constant 1.000000e+00 : f32
    %122 = vector.broadcast %cst_44 : f32 to vector<8x16xf32>
    %123 = arith.subf %122, %116 : vector<8x16xf32>
    %124 = arith.mulf %123, %121 : vector<8x16xf32>
    %125 = arith.mulf %116, %92 : vector<8x16xf32>
    %126 = arith.addf %124, %125 : vector<8x16xf32>
    %cst_45 = arith.constant dense<0.000000e+00> : vector<8x48xf32>
    %127 = tpu.matmul %126, %90, %cst_45 {dimension_numbers = #tpu.dot_dimension_numbers<[1], [0], [0], [1], [0, 0, 1, 1], [], []>} : vector<8x16xf32>, vector<16x48xf32>, vector<8x48xf32> -> vector<8x48xf32>
    %128 = vector.broadcast %91 : vector<1x48xf32> to vector<8x48xf32>
    %129 = arith.addf %127, %128 : vector<8x48xf32>
    %130 = vector.extract_strided_slice %89 {offsets = [8, 0], sizes = [8, 48], strides = [1, 1]} : vector<32x48xf32> to vector<8x48xf32>
    %131 = vector.extract_strided_slice %130 {offsets = [0, 0], sizes = [8, 16], strides = [1, 1]} : vector<8x48xf32> to vector<8x16xf32>
    %132 = vector.extract_strided_slice %129 {offsets = [0, 0], sizes = [8, 16], strides = [1, 1]} : vector<8x48xf32> to vector<8x16xf32>
    %133 = arith.addf %131, %132 : vector<8x16xf32>
    %cst_46 = arith.constant 5.000000e-01 : f32
    %134 = vector.broadcast %cst_46 : f32 to vector<8x16xf32>
    %135 = arith.mulf %134, %133 : vector<8x16xf32>
    %136 = math.tanh %135 : vector<8x16xf32>
    %cst_47 = arith.constant 1.000000e+00 : f32
    %137 = vector.broadcast %cst_47 : f32 to vector<8x16xf32>
    %138 = arith.addf %136, %137 : vector<8x16xf32>
    %cst_48 = arith.constant 5.000000e-01 : f32
    %139 = vector.broadcast %cst_48 : f32 to vector<8x16xf32>
    %140 = arith.mulf %139, %138 : vector<8x16xf32>
    %141 = vector.extract_strided_slice %130 {offsets = [0, 16], sizes = [8, 16], strides = [1, 1]} : vector<8x48xf32> to vector<8x16xf32>
    %142 = vector.extract_strided_slice %129 {offsets = [0, 16], sizes = [8, 16], strides = [1, 1]} : vector<8x48xf32> to vector<8x16xf32>
    %143 = arith.addf %141, %142 : vector<8x16xf32>
    %cst_49 = arith.constant 5.000000e-01 : f32
    %144 = vector.broadcast %cst_49 : f32 to vector<8x16xf32>
    %145 = arith.mulf %144, %143 : vector<8x16xf32>
    %146 = math.tanh %145 : vector<8x16xf32>
    %cst_50 = arith.constant 1.000000e+00 : f32
    %147 = vector.broadcast %cst_50 : f32 to vector<8x16xf32>
    %148 = arith.addf %146, %147 : vector<8x16xf32>
    %cst_51 = arith.constant 5.000000e-01 : f32
    %149 = vector.broadcast %cst_51 : f32 to vector<8x16xf32>
    %150 = arith.mulf %149, %148 : vector<8x16xf32>
    %151 = vector.extract_strided_slice %130 {offsets = [0, 32], sizes = [8, 16], strides = [1, 1]} : vector<8x48xf32> to vector<8x16xf32>
    %152 = vector.extract_strided_slice %129 {offsets = [0, 32], sizes = [8, 16], strides = [1, 1]} : vector<8x48xf32> to vector<8x16xf32>
    %153 = arith.mulf %140, %152 : vector<8x16xf32>
    %154 = arith.addf %151, %153 : vector<8x16xf32>
    %155 = math.tanh %154 : vector<8x16xf32>
    %cst_52 = arith.constant 1.000000e+00 : f32
    %156 = vector.broadcast %cst_52 : f32 to vector<8x16xf32>
    %157 = arith.subf %156, %150 : vector<8x16xf32>
    %158 = arith.mulf %157, %155 : vector<8x16xf32>
    %159 = arith.mulf %150, %126 : vector<8x16xf32>
    %160 = arith.addf %158, %159 : vector<8x16xf32>
    %cst_53 = arith.constant dense<0.000000e+00> : vector<8x48xf32>
    %161 = tpu.matmul %160, %90, %cst_53 {dimension_numbers = #tpu.dot_dimension_numbers<[1], [0], [0], [1], [0, 0, 1, 1], [], []>} : vector<8x16xf32>, vector<16x48xf32>, vector<8x48xf32> -> vector<8x48xf32>
    %162 = vector.broadcast %91 : vector<1x48xf32> to vector<8x48xf32>
    %163 = arith.addf %161, %162 : vector<8x48xf32>
    %164 = vector.extract_strided_slice %89 {offsets = [16, 0], sizes = [8, 48], strides = [1, 1]} : vector<32x48xf32> to vector<8x48xf32>
    %165 = vector.extract_strided_slice %164 {offsets = [0, 0], sizes = [8, 16], strides = [1, 1]} : vector<8x48xf32> to vector<8x16xf32>
    %166 = vector.extract_strided_slice %163 {offsets = [0, 0], sizes = [8, 16], strides = [1, 1]} : vector<8x48xf32> to vector<8x16xf32>
    %167 = arith.addf %165, %166 : vector<8x16xf32>
    %cst_54 = arith.constant 5.000000e-01 : f32
    %168 = vector.broadcast %cst_54 : f32 to vector<8x16xf32>
    %169 = arith.mulf %168, %167 : vector<8x16xf32>
    %170 = math.tanh %169 : vector<8x16xf32>
    %cst_55 = arith.constant 1.000000e+00 : f32
    %171 = vector.broadcast %cst_55 : f32 to vector<8x16xf32>
    %172 = arith.addf %170, %171 : vector<8x16xf32>
    %cst_56 = arith.constant 5.000000e-01 : f32
    %173 = vector.broadcast %cst_56 : f32 to vector<8x16xf32>
    %174 = arith.mulf %173, %172 : vector<8x16xf32>
    %175 = vector.extract_strided_slice %164 {offsets = [0, 16], sizes = [8, 16], strides = [1, 1]} : vector<8x48xf32> to vector<8x16xf32>
    %176 = vector.extract_strided_slice %163 {offsets = [0, 16], sizes = [8, 16], strides = [1, 1]} : vector<8x48xf32> to vector<8x16xf32>
    %177 = arith.addf %175, %176 : vector<8x16xf32>
    %cst_57 = arith.constant 5.000000e-01 : f32
    %178 = vector.broadcast %cst_57 : f32 to vector<8x16xf32>
    %179 = arith.mulf %178, %177 : vector<8x16xf32>
    %180 = math.tanh %179 : vector<8x16xf32>
    %cst_58 = arith.constant 1.000000e+00 : f32
    %181 = vector.broadcast %cst_58 : f32 to vector<8x16xf32>
    %182 = arith.addf %180, %181 : vector<8x16xf32>
    %cst_59 = arith.constant 5.000000e-01 : f32
    %183 = vector.broadcast %cst_59 : f32 to vector<8x16xf32>
    %184 = arith.mulf %183, %182 : vector<8x16xf32>
    %185 = vector.extract_strided_slice %164 {offsets = [0, 32], sizes = [8, 16], strides = [1, 1]} : vector<8x48xf32> to vector<8x16xf32>
    %186 = vector.extract_strided_slice %163 {offsets = [0, 32], sizes = [8, 16], strides = [1, 1]} : vector<8x48xf32> to vector<8x16xf32>
    %187 = arith.mulf %174, %186 : vector<8x16xf32>
    %188 = arith.addf %185, %187 : vector<8x16xf32>
    %189 = math.tanh %188 : vector<8x16xf32>
    %cst_60 = arith.constant 1.000000e+00 : f32
    %190 = vector.broadcast %cst_60 : f32 to vector<8x16xf32>
    %191 = arith.subf %190, %184 : vector<8x16xf32>
    %192 = arith.mulf %191, %189 : vector<8x16xf32>
    %193 = arith.mulf %184, %160 : vector<8x16xf32>
    %194 = arith.addf %192, %193 : vector<8x16xf32>
    %cst_61 = arith.constant dense<0.000000e+00> : vector<8x48xf32>
    %195 = tpu.matmul %194, %90, %cst_61 {dimension_numbers = #tpu.dot_dimension_numbers<[1], [0], [0], [1], [0, 0, 1, 1], [], []>} : vector<8x16xf32>, vector<16x48xf32>, vector<8x48xf32> -> vector<8x48xf32>
    %196 = vector.broadcast %91 : vector<1x48xf32> to vector<8x48xf32>
    %197 = arith.addf %195, %196 : vector<8x48xf32>
    %198 = vector.extract_strided_slice %89 {offsets = [24, 0], sizes = [8, 48], strides = [1, 1]} : vector<32x48xf32> to vector<8x48xf32>
    %199 = vector.extract_strided_slice %198 {offsets = [0, 0], sizes = [8, 16], strides = [1, 1]} : vector<8x48xf32> to vector<8x16xf32>
    %200 = vector.extract_strided_slice %197 {offsets = [0, 0], sizes = [8, 16], strides = [1, 1]} : vector<8x48xf32> to vector<8x16xf32>
    %201 = arith.addf %199, %200 : vector<8x16xf32>
    %cst_62 = arith.constant 5.000000e-01 : f32
    %202 = vector.broadcast %cst_62 : f32 to vector<8x16xf32>
    %203 = arith.mulf %202, %201 : vector<8x16xf32>
    %204 = math.tanh %203 : vector<8x16xf32>
    %cst_63 = arith.constant 1.000000e+00 : f32
    %205 = vector.broadcast %cst_63 : f32 to vector<8x16xf32>
    %206 = arith.addf %204, %205 : vector<8x16xf32>
    %cst_64 = arith.constant 5.000000e-01 : f32
    %207 = vector.broadcast %cst_64 : f32 to vector<8x16xf32>
    %208 = arith.mulf %207, %206 : vector<8x16xf32>
    %209 = vector.extract_strided_slice %198 {offsets = [0, 16], sizes = [8, 16], strides = [1, 1]} : vector<8x48xf32> to vector<8x16xf32>
    %210 = vector.extract_strided_slice %197 {offsets = [0, 16], sizes = [8, 16], strides = [1, 1]} : vector<8x48xf32> to vector<8x16xf32>
    %211 = arith.addf %209, %210 : vector<8x16xf32>
    %cst_65 = arith.constant 5.000000e-01 : f32
    %212 = vector.broadcast %cst_65 : f32 to vector<8x16xf32>
    %213 = arith.mulf %212, %211 : vector<8x16xf32>
    %214 = math.tanh %213 : vector<8x16xf32>
    %cst_66 = arith.constant 1.000000e+00 : f32
    %215 = vector.broadcast %cst_66 : f32 to vector<8x16xf32>
    %216 = arith.addf %214, %215 : vector<8x16xf32>
    %cst_67 = arith.constant 5.000000e-01 : f32
    %217 = vector.broadcast %cst_67 : f32 to vector<8x16xf32>
    %218 = arith.mulf %217, %216 : vector<8x16xf32>
    %219 = vector.extract_strided_slice %198 {offsets = [0, 32], sizes = [8, 16], strides = [1, 1]} : vector<8x48xf32> to vector<8x16xf32>
    %220 = vector.extract_strided_slice %197 {offsets = [0, 32], sizes = [8, 16], strides = [1, 1]} : vector<8x48xf32> to vector<8x16xf32>
    %221 = arith.mulf %208, %220 : vector<8x16xf32>
    %222 = arith.addf %219, %221 : vector<8x16xf32>
    %223 = math.tanh %222 : vector<8x16xf32>
    %cst_68 = arith.constant 1.000000e+00 : f32
    %224 = vector.broadcast %cst_68 : f32 to vector<8x16xf32>
    %225 = arith.subf %224, %218 : vector<8x16xf32>
    %226 = arith.mulf %225, %223 : vector<8x16xf32>
    %227 = arith.mulf %218, %194 : vector<8x16xf32>
    %228 = arith.addf %226, %227 : vector<8x16xf32>
    %c448 = arith.constant 448 : index
    %c0_69 = arith.constant 0 : index
    %229 = vector.load %arg1[%c448, %c0_69] : memref<560x128xf32, #tpu.memory_space<vmem>>, vector<16x32xf32>
    %cst_70 = arith.constant dense<0.000000e+00> : vector<8x32xf32>
    %230 = tpu.matmul %228, %229, %cst_70 {dimension_numbers = #tpu.dot_dimension_numbers<[1], [0], [0], [1], [0, 0, 1, 1], [], []>} : vector<8x16xf32>, vector<16x32xf32>, vector<8x32xf32> -> vector<8x32xf32>
    %c464 = arith.constant 464 : index
    %c0_71 = arith.constant 0 : index
    %231 = vector.load %arg1[%c464, %c0_71] : memref<560x128xf32, #tpu.memory_space<vmem>>, vector<32x32xf32>
    %cst_72 = arith.constant dense<0.000000e+00> : vector<8x32xf32>
    %232 = tpu.matmul %230, %231, %cst_72 {dimension_numbers = #tpu.dot_dimension_numbers<[1], [0], [0], [1], [0, 0, 1, 1], [], []>} : vector<8x32xf32>, vector<32x32xf32>, vector<8x32xf32> -> vector<8x32xf32>
    %cst_73 = arith.constant dense<0xFF800000> : vector<8xf32>
    %233 = vector.multi_reduction <maximumf>, %232, %cst_73 [1] : vector<8x32xf32> to vector<8xf32>
    %234 = vector.shape_cast %233 : vector<8xf32> to vector<8x1xf32>
    %235 = vector.broadcast %234 : vector<8x1xf32> to vector<8x32xf32>
    %236 = arith.subf %232, %235 : vector<8x32xf32>
    %237 = math.exp %236 : vector<8x32xf32>
    %c528 = arith.constant 528 : index
    %c0_74 = arith.constant 0 : index
    %238 = vector.load %arg1[%c528, %c0_74] : memref<560x128xf32, #tpu.memory_space<vmem>>, vector<32x32xf32>
    %cst_75 = arith.constant dense<0.000000e+00> : vector<8x32xf32>
    %239 = tpu.matmul %237, %238, %cst_75 {dimension_numbers = #tpu.dot_dimension_numbers<[1], [0], [0], [1], [0, 0, 1, 1], [], []>} : vector<8x32xf32>, vector<32x32xf32>, vector<8x32xf32> -> vector<8x32xf32>
    %240 = tpu.reciprocal %239 {approx = true} : vector<8x32xf32> -> vector<8x32xf32>
    %241 = arith.mulf %237, %240 : vector<8x32xf32>
    %c496 = arith.constant 496 : index
    %c0_76 = arith.constant 0 : index
    %242 = vector.load %arg1[%c496, %c0_76] : memref<560x128xf32, #tpu.memory_space<vmem>>, vector<32x32xf32>
    %cst_77 = arith.constant dense<0.000000e+00> : vector<8x32xf32>
    %243 = tpu.matmul %241, %242, %cst_77 {dimension_numbers = #tpu.dot_dimension_numbers<[1], [0], [0], [1], [0, 0, 1, 1], [], []>} : vector<8x32xf32>, vector<32x32xf32>, vector<8x32xf32> -> vector<8x32xf32>
    %c0_78 = arith.constant 0 : index
    %c0_79 = arith.constant 0 : index
    %244 = vector.load %arg2[%c0_78, %c0_79] : memref<8x32xf32, #tpu.memory_space<vmem>>, vector<8x32xf32>
    tpu.vector_store %arg2[%c0_78, %c0_79], %243 {strides = array<i32>} : memref<8x32xf32, #tpu.memory_space<vmem>>, vector<8x32xf32>,
    return
  }
}

</mosaic_0001>

<bundles_post_ra>
// kernel: forward.1
= control target key start
LH: loop header
LB: loop body
LE: loop exit
PB: predicated region body
PF: predicated region fallthrough
CT: control target
= control target key end

     0   :  { %7 = vsyncpa [#allocation3], 0  ;;  %s2681_s0 = inlined_call_operand.hbm [shape: f32[32,16], index: 0, kind: input, shape index: {}]   ;;  %s2682_s1 = inlined_call_operand.hbm [shape: f32[560,128], index: 1, kind: input, shape index: {}]   ;;  %s2683_s2 = inlined_call_operand.vmem [shape: f32[8,32], index: 2, kind: output, shape index: {}]  }
   0x1   :  { %8 = vsyncpa [#allocation5], 0  ;;  %s2452_s9 = smov [#allocation2]  }
   0x2   :  { %s14_s10 = sshll.u32 %s2452_s9, 4  ;;  %s15_s10 = int_to_ptr.vmem [resolvable:$true] %s14_s10 }
   0x3   :  { %s2416_s11 = scalar_lea.vmem %s15_s10, 512  ;;  %p2421_p1 = scmp.lt.s32.totalorder %s15_s10, %s15_s10 }
   0x4   :  { %p2417_p0 = scmp.ne.s32.totalorder %s15_s10, %s2416_s11  ;;  %p2422_p2 = scmp.lt.s32.totalorder %s2416_s11, %s2416_s11 }
   0x6   :  { %p2423_p3 = por %p2422_p2, %p2421_p1 }
   0x8   :  { %p2424_p4 = pnand %p2423_p3, %p2417_p0 }
   0xa   :  { %2427 = shalt.err (!%p2424_p4)
}
   0xb   :  { %s2453_s12 = smov 128   ;;  %s2454_s13 = smov 8  }
   0xc   :  { %20 = dma.hbm_to_vmem [thread:$0]  %s2681_s0, 512, %s15_s10, [#allocation3], %s2453_s12, %s2453_s12, %s2454_s13  }
   0xd   :  { %s2455_s16 = smov [#allocation4]  }
   0xe   :  { %s26_s17 = sshll.u32 %s2455_s16, 4  ;;  %s27_s17 = int_to_ptr.vmem [resolvable:$true] %s26_s17 }
   0xf   :  { %s2436_s18 = scalar_lea.vmem %s27_s17, 8960  ;;  %p2441_p6 = scmp.lt.s32.totalorder %s27_s17, %s27_s17 }
  0x10   :  { %p2437_p5 = scmp.ne.s32.totalorder %s27_s17, %s2436_s18  ;;  %p2442_p7 = scmp.lt.s32.totalorder %s2436_s18, %s2436_s18 }
  0x12   :  { %p2443_p8 = por %p2442_p7, %p2441_p6 }
  0x14   :  { %p2444_p9 = pnand %p2443_p8, %p2437_p5 }
  0x16   :  { %2447 = shalt.err (!%p2444_p9)
}
  0x17   :  { %32 = dma.hbm_to_vmem [thread:$0]  %s2682_s1, 8960, %s27_s17, [#allocation5], %s2453_s12, %s2453_s12, %s2454_s13  }
  0x18   :  { %2448 = dma.done.wait [#allocation3], 512  }
  0x19   :  { %2449 = vsyncadd [#allocation3], 4294966784 }
  0x1a   :  { %2450 = dma.done.wait [#allocation5], 8960  }
  0x1b   :  { %2451 = vsyncadd [#allocation5], 4294958336  ;;  %vm49_vm0 = vcmask 261120   ;;  %v48_v0 = vld [vmem:[#allocation2 + $0x18] sm:$0xff]  ;;  %v47_v1 = vld [vmem:[#allocation2 + $0x10] sm:$0xff]  ;;  %vm169_vm1 = vcmask 130048  }
  0x1c   :  { %2169 = vmatprep.subr.mxu0 %v48_v0  ;;  %v39_v2 = vld [vmem:[#allocation4] sm:$0xff]  ;;  %v46_v3 = vld [vmem:[#allocation2 + $0x8] sm:$0xff]  ;;  %v41_v6 = vld [vmem:[#allocation4 + $0x10] sm:$0xff]  ;;  %v2456_v22 = vmov 0.0   ;;  %vm2457_vm2 = vmmov 0   ;;  %vm435_vm3 = vcmask 1040384  }
  0x1d   :  { %2170 = vmatpush3.msra.mxu0 %v48_v0  ;;  %2177 = vmatprep.mubr.msk.f32.mxu0 %vm49_vm0, %v39_v2  ;;  %v45_v4 = vld [vmem:[#allocation2] sm:$0xff]  ;;  %v40_v5 = vld [vmem:[#allocation4 + $0x8] sm:$0xff]  ;;  %v42_v7 = vld [vmem:[#allocation4 + $0x18] sm:$0xff]  ;;  %v515_v2 = vlaneseq  ;;  %s2458_s0 = smov 96   ;;  %s2459_s1 = smov 32  }
  0x1e   :  { %2171 = vmatprep.subr.mxu0 %v47_v1  ;;  %v43_v8 = vld [vmem:[#allocation4 + $0x20] sm:$0xff]  ;;  %v44_v9 = vld [vmem:[#allocation4 + $0x28] sm:$0xff]  ;;  %v164_v12 = vld [vmem:[#allocation4 + $0x38] sm:$0xff]  ;;  %s2460_s21 = smov 112  }
  0x1f   :  { %2172 = vmatpush3.msra.mxu0 %v47_v1  ;;  %v166_v10 = vld [vmem:[#allocation4 + $0x48] sm:$0xff]  ;;  %v165_v11 = vld [vmem:[#allocation4 + $0x40] sm:$0xff]  ;;  %v163_v17 = vld [vmem:[#allocation4 + $0x30] sm:$0xff] }
  0x20   :  { %2173 = vmatprep.subr.mxu0 %v46_v3  ;;  %2186 = vmatprep.subr.mxu1 %v166_v10  ;;  %v168_v19 = vld [vmem:[#allocation4 + $0x58] sm:$0xff]  ;;  %v167_v21 = vld [vmem:[#allocation4 + $0x50] sm:$0xff]  ;;  %v438_v25 = vld [vmem:[#allocation4 + $0x68] sm:$0xff] }
  0x21   :  { %2174 = vmatpush3.msra.mxu0 %v46_v3  ;;  %2187 = vmatpush3.msra.mxu1 %v166_v10  ;;  %v440_v23 = vld [vmem:[#allocation4 + $0x78] sm:$0xff]  ;;  %v439_v24 = vld [vmem:[#allocation4 + $0x70] sm:$0xff]  ;;  %v437_v26 = vld [vmem:[#allocation4 + $0x60] sm:$0xff]  ;;  %v2507_v3 = vshrl.u32 %v515_v2, 7 }
  0x22   :  { %2175 = vmatprep.subr.mxu0 %v45_v4  ;;  %2188 = vmatprep.subr.mxu1 %v165_v11  ;;  %v548_v58 = vld [vmem:[#allocation4 + $0x90] sm:$0xff] }
  0x23   :  { %2176 = vmatpush3.msra.mxu0 %v45_v4  ;;  %2189 = vmatpush3.msra.mxu1 %v165_v11  ;;  %v528_v4 = vld [vmem:[#allocation4 + $0x80] sm:$0x1] }
  0x24   :  { %2178 = vmatmul.mubr.msk.f32.vlgmr.msra.gmra.mxu0 %vm49_vm0, %v40_v5  ;;  %2193 = vmatprep.subr.mxu1 %v164_v12  ;;  %v517_v5 = vsub.s32 0, %v2507_v3 }
  0x25   :  { %2180 = vmatprep.mubr.msk.f32.mxu0 %vm49_vm0, %v41_v6  ;;  %2207 = vmatprep.subr.mxu0 %v2456_v22  ;;  %v530_v6 = vrot.slane %v528_v4, 7 }
  0x26   :  { %2208 = vmatpush3.msra.mxu0 %v440_v23  ;;  %v732_v23 = vld [vmem:[#allocation4 + $0x148] sm:$0xff] }
  0x27   :  { %2209 = vmatprep.subr.mxu0 %v2456_v22 }
  0x28   :  { %2181 = vmatmul.mubr.msk.f32.gmra.mxu0 %vm49_vm0, %v42_v7 }
  0x29   :  { %2183 = vmatprep.mubr.msk.f32.mxu0 %vm49_vm0, %v43_v8  ;;  %2210 = vmatpush3.msra.mxu0 %v439_v24  ;;  %v535_v8 = vsub.s32 1, %v2507_v3  ;;  %v550_v24 = vld [vmem:[#allocation4 + $0xa0] sm:$0xff] }
  0x2a   :  { %2211 = vmatprep.subr.mxu0 %v2456_v22 }
  0x2b   :  { %2212 = vmatpush3.msra.mxu0 %v438_v25  ;;  %v551_v25 = vld [vmem:[#allocation4 + $0xa8] sm:$0xff] }
  0x2c   :  { %2184 = vmatmul.mubr.msk.f32.gmra.mxu0 %vm49_vm0, %v44_v9  ;;  %2213 = vmatprep.subr.mxu0 %v2456_v22 }
  0x2d   :  { %2215 = vmatprep.mubr.msk.f32.mxu0 %vm2457_vm2, %v2456_v22  ;;  %2214 = vmatpush3.msra.mxu0 %v437_v26  ;;  %v552_v26 = vld [vmem:[#allocation4 + $0xb0] sm:$0xff] }
  0xe4   :  { %v2179_v13 = vpop.f32.mrf.mxu0 }
  0xe6   :  { %v134_v14 = vpop.f32.mrf.mxu0 }
  0xe8   :  { %v2182_v15 = vpop.f32.mrf.mxu0 }
  0xea   :  { %v144_v16 = vpop.f32.mrf.mxu0 }
  0xeb   :  { %2190 = vmatprep.mubr.msk.f32.mxu1 %vm169_vm1, %v144_v16 }
  0xec   :  { %2191 = vmatmul.mubr.msk.f32.vlgmr.msra.gmra.mxu1 %vm169_vm1, %v2182_v15  ;;  %v2185_v18 = vpop.f32.mrf.mxu0 }
  0xed   :  { %2194 = vmatpush3.msra.mxu1 %v164_v12  ;;  %2197 = vmatprep.mubr.msk.f32.mxu1 %vm169_vm1, %v134_v14  ;;  %v2021_v14 = vld [vmem:[#allocation4 + $0x88] ss:$0 sm:$0xff] }
  0xee   :  { %2195 = vmatprep.subr.mxu1 %v163_v17  ;;  %v154_v20 = vpop.f32.mrf.mxu0 }
  0xef   :  { %2196 = vmatpush3.msra.mxu1 %v163_v17 }
  0xf0   :  { %2198 = vmatmul.mubr.msk.f32.vlgmr.msra.gmra.mxu1 %vm169_vm1, %v2179_v13  ;;  %2200 = vmatprep.subr.mxu1 %v168_v19 }
  0xf1   :  { %2201 = vmatpush3.msra.mxu1 %v168_v19  ;;  %2204 = vmatprep.mubr.msk.f32.mxu1 %vm169_vm1, %v154_v20 }
  0xf2   :  { %2202 = vmatprep.subr.mxu1 %v167_v21 }
  0xf3   :  { %2203 = vmatpush3.msra.mxu1 %v167_v21  ;;  %v549_v21 = vld [vmem:[#allocation4 + $0x98] sm:$0xff] }
  0xf4   :  { %2205 = vmatmul.mubr.msk.f32.vlgmr.msra.gmra.mxu1 %vm169_vm1, %v2185_v18 }
  0xf5   :  { %2222 = vmatprep.mubr.msk.f32.mxu1 %vm169_vm1, %v548_v58  ;;  %v1061_v58 = vld [vmem:[#allocation4 + $0x160] sm:$0xff] }
 0x1ac   :  { %v2192_v27 = vpop.f32.mrf.mxu1 }
 0x1ae   :  { %v242_v28 = vpop.f32.mrf.mxu1 }
 0x1b0   :  { %v2199_v29 = vpop.f32.mrf.mxu1 }
 0x1b1   :  { %v329_v31 = vadd.f32 %v2199_v29, %v2192_v27  ;;  %v553_v27 = vld [vmem:[#allocation4 + $0xb8] sm:$0xff]  ;;  %v555_v29 = vld [vmem:[#allocation4 + $0xc8] sm:$0xff] }
 0x1b2   :  { %v323_v30 = vpop.f32.mrf.mxu1 }
 0x1b3   :  { %v324_v33 = vadd.f32 %v323_v30, %v242_v28  ;;  %v554_v28 = vld [vmem:[#allocation4 + $0xc0] sm:$0xff]  ;;  %v556_v30 = vld [vmem:[#allocation4 + $0xd0] sm:$0xff] }
 0x1b4   :  { %v2206_v32 = vpop.f32.mrf.mxu1 }
 0x1b5   :  { %v414_v34 = vadd.f32 %v2206_v32, %v329_v31  ;;  %v557_v31 = vld [vmem:[#allocation4 + $0xd8] sm:$0xff]  ;;  %v558_v32 = vld [vmem:[#allocation4 + $0xe0] sm:$0xff] }
 0x1b6   :  { %v404_v35 = vpop.f32.mrf.mxu1 }
 0x1b7   :  { %v425_v36 = vmul.f32 %v414_v34, %v414_v34  ;;  %v413_v37 = vadd.f32 %v404_v35, %v324_v33  ;;  %v416_v38 = vsel %vm49_vm0, %v414_v34, 0.0  ;;  %v559_v33 = vld [vmem:[#allocation4 + $0xe8] sm:$0xff]  ;;  %v731_v35 = vld [vmem:[#allocation4 + $0x140] sm:$0xff] }
 0x1b9   :  { %v415_v39 = vsel %vm49_vm0, %v413_v37, 0.0  ;;  %v424_v40 = vmul.f32 %v413_v37, %v413_v37  ;;  %v427_v42 = vsel %vm49_vm0, %v425_v36, 0.0  ;;  %v727_v36 = vld [vmem:[#allocation4 + $0x120] sm:$0xff] }
 0x1ba   :  { %v417_v41 = vadd.f32 %v416_v38, %v415_v39  ;;  %v725_v38 = vld [vmem:[#allocation4 + $0x110] sm:$0xff]  ;;  %v730_v39 = vld [vmem:[#allocation4 + $0x138] sm:$0xff] }
 0x1bb   :  { %v426_v43 = vsel %vm49_vm0, %v424_v40, 0.0  ;;  %v724_v40 = vld [vmem:[#allocation4 + $0x108] sm:$0xff] }
 0x1bc   :  { %v418_v44 = vrot.slane %v417_v41, 4  ;;  %v428_v45 = vadd.f32 %v427_v42, %v426_v43 }
 0x1be   :  { %v419_v46 = vadd.f32 %v418_v44, %v417_v41  ;;  %v429_v47 = vrot.slane %v428_v45, 4  ;;  %v729_v41 = vld [vmem:[#allocation4 + $0x130] sm:$0xff] }
 0x1c0   :  { %v420_v48 = vrot.slane %v419_v46, 2  ;;  %v430_v49 = vadd.f32 %v429_v47, %v428_v45 }
 0x1c2   :  { %v421_v50 = vadd.f32 %v420_v48, %v419_v46  ;;  %v431_v51 = vrot.slane %v430_v49, 2  ;;  %v723_v48 = vld [vmem:[#allocation4 + $0x100] sm:$0xff] }
 0x1c4   :  { %v422_v52 = vrot.slane %v421_v50, 1  ;;  %v432_v53 = vadd.f32 %v431_v51, %v430_v49 }
 0x1c6   :  { %v433_v54 = vrot.slane %v432_v53, 1  ;;  %v423_v55 = vadd.f32 %v422_v52, %v421_v50  ;;  %v722_v50 = vld [vmem:[#allocation4 + $0xf8] sm:$0xff]  ;;  %v721_v52 = vld [vmem:[#allocation4 + $0xf0] sm:$0xff] }
 0x1c8   :  { %v434_v56 = vadd.f32 %v433_v54, %v432_v53 }
 0x1ca   :  { %v436_v57 = vsel %vm435_vm3, %v423_v55, %v434_v56 }
 0x1cb   :  { %2216 = vmatmul.mubr.msk.f32.vlgmr.msra.gmra.mxu0 %vm49_vm0, %v436_v57  ;;  %v1062_v57 = vld [vmem:[#allocation4 + $0x168] sm:$0xff] }
 0x28b   :  { %v510_v59 = vpop.f32.mrf.mxu0 }
 0x28c   :  { %v514_v60 = vmul.f32 0.0078125, %v510_v59  ;;  %v1060_v59 = vld [vmem:[#allocation4 + $0x158] sm:$0xff] }
 0x28d   :  { %v2217_v61 = vpop.f32.mrf.mxu0 }
 0x28e   :  { %v521_v62 = vmul.f32 %v514_v60, %v514_v60  ;;  %v518_v7 = vrot.slane %v514_v60, %v517_v5 }
 0x290   :  { %v523_v63 = vrot.slane %v521_v62, 7  ;;  %v519_v11 = vsub.f32 %v413_v37, %v518_v7  ;;  %v520_v12 = vsub.f32 %v414_v34, %v518_v7  ;;  %v728_v34 = vld [vmem:[#allocation4 + $0x128] sm:$0xff]  ;;  %v726_v37 = vld [vmem:[#allocation4 + $0x118] sm:$0xff] }
 0x291   :  { %2240 = vmatprep.subr.mxu0 %v728_v34 }
 0x292   :  { %v525_v0 = vsub.f32 %v514_v60, %v523_v63  ;;  %2241 = vmatpush3.msra.mxu0 %v728_v34  ;;  %v1059_v60 = vld [vmem:[#allocation4 + $0x150] sm:$0xff] }
 0x293   :  { %2242 = vmatprep.subr.mxu0 %v727_v36 }
 0x294   :  { %v526_v1 = vadd.f32 1e-05, %v525_v0  ;;  %2243 = vmatpush3.msra.mxu0 %v727_v36 }
 0x295   :  { %2244 = vmatprep.subr.mxu0 %v726_v37 }
 0x296   :  { %2384 = vrsqrt.f32 %v526_v1  ;;  %2245 = vmatpush3.msra.mxu0 %v726_v37 }
 0x297   :  { %2246 = vmatprep.subr.mxu0 %v725_v38 }
 0x298   :  { %2247 = vmatpush3.msra.mxu0 %v725_v38 }
 0x299   :  { %2254 = vmatprep.subr.mxu0 %v724_v40 }
 0x2a3   :  { %v2385_v9 = vpop.eup %2384 }
 0x2a4   :  { %v532_v10 = vmul.f32 %v2385_v9, %v530_v6 }
 0x2a6   :  { %v536_v13 = vrot.slane %v532_v10, %v535_v8 }
 0x2a8   :  { %v538_v15 = vmul.f32 %v536_v13, %v520_v12  ;;  %v537_v16 = vmul.f32 %v536_v13, %v519_v11 }
 0x2aa   :  { %v545_v17 = vadd.f32 %v2021_v14, %v538_v15  ;;  %v544_v18 = vadd.f32 %v2021_v14, %v537_v16 }
 0x2ac   :  { %v547_v19 = vmax.f32 %v545_v17, 0.0  ;;  %v546_v20 = vmax.f32 %v544_v18, 0.0 }
 0x2ae   :  { %2218 = vmatprep.subr.mxu1 %v547_v19 }
 0x2af   :  { %2219 = vmatpush3.msra.mxu1 %v547_v19 }
 0x2b0   :  { %2220 = vmatprep.subr.mxu1 %v546_v20 }
 0x2b1   :  { %2221 = vmatpush3.msra.mxu1 %v546_v20 }
 0x2b2   :  { %2223 = vmatmul.mubr.msk.f32.vlgmr.msra.gmra.mxu1 %vm169_vm1, %v549_v21  ;;  %2268 = vmatprep.subr.mxu1 %v732_v23 }
 0x2b3   :  { %2225 = vmatprep.mubr.msk.f32.mxu1 %vm169_vm1, %v550_v24  ;;  %2269 = vmatpush3.msra.mxu1 %v732_v23 }
 0x2b4   :  { %2270 = vmatprep.subr.mxu1 %v731_v35 }
 0x2b5   :  { %2271 = vmatpush3.msra.mxu1 %v731_v35 }
 0x2b6   :  { %2226 = vmatmul.mubr.msk.f32.gmra.mxu1 %vm169_vm1, %v551_v25  ;;  %2272 = vmatprep.subr.mxu1 %v730_v39 }
 0x2b7   :  { %2228 = vmatprep.mubr.msk.f32.mxu1 %vm169_vm1, %v552_v26  ;;  %2273 = vmatpush3.msra.mxu1 %v730_v39 }
 0x2b8   :  { %2274 = vmatprep.subr.mxu1 %v729_v41 }
 0x2b9   :  { %2275 = vmatpush3.msra.mxu1 %v729_v41 }
 0x2ba   :  { %2229 = vmatmul.mubr.msk.f32.gmra.mxu1 %vm169_vm1, %v553_v27 }
 0x2bb   :  { %2231 = vmatprep.mubr.msk.f32.mxu1 %vm169_vm1, %v554_v28 }
 0x2be   :  { %2232 = vmatmul.mubr.msk.f32.gmra.mxu1 %vm169_vm1, %v555_v29 }
 0x2bf   :  { %2234 = vmatprep.mubr.msk.f32.mxu1 %vm169_vm1, %v556_v30 }
 0x2c2   :  { %2235 = vmatmul.mubr.msk.f32.gmra.mxu1 %vm169_vm1, %v557_v31 }
 0x2c3   :  { %2237 = vmatprep.mubr.msk.f32.mxu1 %vm169_vm1, %v558_v32 }
 0x2c6   :  { %2238 = vmatmul.mubr.msk.f32.gmra.mxu1 %vm169_vm1, %v559_v33 }
 0x372   :  { %v2224_v42 = vpop.f32.mrf.mxu1 }
 0x374   :  { %v662_v43 = vpop.f32.mrf.mxu1 }
 0x376   :  { %v2227_v44 = vpop.f32.mrf.mxu1 }
 0x378   :  { %v672_v45 = vpop.f32.mrf.mxu1 }
 0x37a   :  { %v2230_v46 = vpop.f32.mrf.mxu1 }
 0x37c   :  { %v682_v47 = vpop.f32.mrf.mxu1 }
 0x37d   :  { %2248 = vmatprep.mubr.msk.f32.mxu0 %vm49_vm0, %v682_v47 }
 0x37e   :  { %v2233_v49 = vpop.f32.mrf.mxu1  ;;  %2249 = vmatmul.mubr.msk.f32.vlgmr.msra.gmra.mxu0 %vm49_vm0, %v2230_v46 }
 0x37f   :  { %2255 = vmatpush3.msra.mxu0 %v724_v40 }
 0x380   :  { %v692_v51 = vpop.f32.mrf.mxu1  ;;  %2256 = vmatprep.subr.mxu0 %v723_v48 }
 0x381   :  { %2251 = vmatprep.mubr.msk.f32.mxu0 %vm49_vm0, %v692_v51  ;;  %2257 = vmatpush3.msra.mxu0 %v723_v48  ;;  %v2573_v51 = vld [vmem:[#allocation4 + $0x1b0] sm:$0xff] }
 0x382   :  { %v2236_v53 = vpop.f32.mrf.mxu1  ;;  %2252 = vmatmul.mubr.msk.f32.gmra.mxu0 %vm49_vm0, %v2233_v49  ;;  %2258 = vmatprep.subr.mxu0 %v722_v50 }
 0x383   :  { %2259 = vmatpush3.msra.mxu0 %v722_v50  ;;  %2262 = vmatprep.mubr.msk.f32.mxu0 %vm49_vm0, %v662_v43 }
 0x384   :  { %v702_v54 = vpop.f32.mrf.mxu1  ;;  %2260 = vmatprep.subr.mxu0 %v721_v52 }
 0x385   :  { %2261 = vmatpush3.msra.mxu0 %v721_v52  ;;  %2276 = vmatprep.mubr.msk.f32.mxu1 %vm49_vm0, %v702_v54  ;;  %v1181_v54 = vld [vmem:[#allocation4 + $0x198] sm:$0xff] }
 0x386   :  { %v2239_v55 = vpop.f32.mrf.mxu1  ;;  %2263 = vmatmul.mubr.msk.f32.vlgmr.msra.gmra.mxu0 %vm49_vm0, %v2224_v42  ;;  %2277 = vmatmul.mubr.msk.f32.vlgmr.msra.gmra.mxu1 %vm49_vm0, %v2236_v53  ;;  %v2577_v53 = vld [vmem:[#allocation4 + $0x1a8] sm:$0xff] }
 0x387   :  { %2265 = vmatprep.mubr.msk.f32.mxu0 %vm49_vm0, %v672_v45  ;;  %2282 = vmatprep.subr.mxu0 %v2456_v22 }
 0x388   :  { %v712_v56 = vpop.f32.mrf.mxu1  ;;  %2283 = vmatpush3.msra.mxu0 %v1062_v57  ;;  %2293 = vmatprep.subr.mxu1 %v1181_v54  ;;  %v1178_v57 = vld [vmem:[#allocation4 + $0x180] sm:$0xff] }
 0x389   :  { %2279 = vmatprep.mubr.msk.f32.mxu1 %vm49_vm0, %v712_v56  ;;  %2284 = vmatprep.subr.mxu0 %v2456_v22  ;;  %v1179_v56 = vld [vmem:[#allocation4 + $0x188] sm:$0xff] }
 0x38a   :  { %2266 = vmatmul.mubr.msk.f32.gmra.mxu0 %vm49_vm0, %v2227_v44  ;;  %2280 = vmatmul.mubr.msk.f32.gmra.mxu1 %vm49_vm0, %v2239_v55  ;;  %v1180_v55 = vld [vmem:[#allocation4 + $0x190] sm:$0xff] }
 0x38b   :  { %2290 = vmatprep.mubr.msk.f32.mxu0 %vm2457_vm2, %v2456_v22  ;;  %2285 = vmatpush3.msra.mxu0 %v1061_v58 }
 0x38c   :  { %2286 = vmatprep.subr.mxu0 %v2456_v22  ;;  %2294 = vmatpush3.msra.mxu1 %v1181_v54 }
 0x38d   :  { %2287 = vmatpush3.msra.mxu0 %v1060_v59  ;;  %2295 = vmatprep.subr.mxu1 %v1180_v55 }
 0x38e   :  { %2288 = vmatprep.subr.mxu0 %v2456_v22  ;;  %2296 = vmatpush3.msra.mxu1 %v1180_v55 }
 0x38f   :  { %2289 = vmatpush3.msra.mxu0 %v1059_v60  ;;  %2297 = vmatprep.subr.mxu1 %v1179_v56 }
 0x390   :  { %2307 = vmatprep.subr.mxu0 %v2456_v22  ;;  %2298 = vmatpush3.msra.mxu1 %v1179_v56 }
 0x391   :  { %2299 = vmatprep.subr.mxu1 %v1178_v57 }
 0x392   :  { %2300 = vmatpush3.msra.mxu1 %v1178_v57 }
 0x393   :  { %2328 = vmatprep.subr.mxu1 %v2456_v22 }
 0x43e   :  { %v2250_v61 = vpop.f32.mrf.mxu0 }
 0x440   :  { %v811_v62 = vpop.f32.mrf.mxu0 }
 0x442   :  { %v2253_v63 = vpop.f32.mrf.mxu0 }
 0x444   :  { %v821_v0 = vpop.f32.mrf.mxu0 }
 0x446   :  { %v2264_v1 = vpop.f32.mrf.mxu0  ;;  %v2278_v2 = vpop.f32.mrf.mxu1 }
 0x447   :  { %v914_v4 = vadd.f32 %v2264_v1, %v2250_v61 }
 0x448   :  { %v908_v6 = vpop.f32.mrf.mxu0  ;;  %v1005_v7 = vpop.f32.mrf.mxu1 }
 0x449   :  { %v909_v9 = vadd.f32 %v908_v6, %v811_v62  ;;  %v2545_v10 = vadd.f32 %v2278_v2, %v914_v4  ;;  %v2593_v62 = vld [vmem:[#allocation4 + $0x1b8] ss:$0 sm:$0xff] }
 0x44a   :  { %v2267_v11 = vpop.f32.mrf.mxu0  ;;  %v2281_v14 = vpop.f32.mrf.mxu1 }
 0x44b   :  { %v2547_v12 = vadd.f32 %v1005_v7, %v909_v9  ;;  %v924_v13 = vadd.f32 %v2267_v11, %v2253_v63  ;;  %v1042_v17 = vmul.f32 %v2545_v10, %v2545_v10  ;;  %v1029_v23 = vsel %vm49_vm0, %v2545_v10, 0.0  ;;  %v1152_v7 = vld [vmem:[#allocation4 + $0x170] sm:$0x1] }
 0x44c   :  { %v918_v15 = vpop.f32.mrf.mxu0  ;;  %v1015_v21 = vpop.f32.mrf.mxu1  ;;  %v1154_v9 = vrot.slane %v1152_v7, 7 }
 0x44d   :  { %v1041_v16 = vmul.f32 %v2547_v12, %v2547_v12  ;;  %v1028_v18 = vsel %vm49_vm0, %v2547_v12, 0.0  ;;  %v2555_v19 = vadd.f32 %v2281_v14, %v924_v13  ;;  %v919_v20 = vadd.f32 %v918_v15, %v821_v0 }
 0x44e   :  { %v1030_v26 = vadd.f32 %v1029_v23, %v1028_v18  ;;  %v1046_v27 = vsel %vm49_vm0, %v1042_v17, 0.0 }
 0x44f   :  { %v1045_v24 = vsel %vm49_vm0, %v1041_v16, 0.0  ;;  %v2560_v25 = vadd.f32 %v1015_v21, %v919_v20  ;;  %v1044_v28 = vmul.f32 %v2555_v19, %v2555_v19  ;;  %v1033_v33 = vsel %vm49_vm0, %v2555_v19, 0.0  ;;  %v2047_v20 = vld [vmem:[#allocation4 + $0x178] ss:$0 sm:$0xff] }
 0x450   :  { %v1047_v31 = vadd.f32 %v1046_v27, %v1045_v24 }
 0x451   :  { %v1031_v29 = vsel %vm49_vm0, %v2560_v25, 0.0  ;;  %v1043_v30 = vmul.f32 %v2560_v25, %v2560_v25  ;;  %v1050_v37 = vsel %vm49_vm0, %v1044_v28, 0.0 }
 0x452   :  { %v1032_v32 = vadd.f32 %v1031_v29, %v1030_v26 }
 0x453   :  { %v1048_v34 = vsel %vm49_vm0, %v1043_v30, 0.0 }
 0x454   :  { %v1034_v35 = vadd.f32 %v1033_v33, %v1032_v32  ;;  %v1049_v36 = vadd.f32 %v1048_v34, %v1047_v31 }
 0x456   :  { %v1035_v38 = vrot.slane %v1034_v35, 4  ;;  %v1051_v39 = vadd.f32 %v1050_v37, %v1049_v36 }
 0x458   :  { %v1036_v40 = vadd.f32 %v1035_v38, %v1034_v35  ;;  %v1052_v41 = vrot.slane %v1051_v39, 4 }
 0x45a   :  { %v1037_v42 = vrot.slane %v1036_v40, 2  ;;  %v1053_v43 = vadd.f32 %v1052_v41, %v1051_v39 }
 0x45c   :  { %v1038_v44 = vadd.f32 %v1037_v42, %v1036_v40  ;;  %v1054_v45 = vrot.slane %v1053_v43, 2 }
 0x45e   :  { %v1039_v46 = vrot.slane %v1038_v44, 1  ;;  %v1055_v47 = vadd.f32 %v1054_v45, %v1053_v43 }
 0x460   :  { %v1056_v48 = vrot.slane %v1055_v47, 1  ;;  %v1040_v49 = vadd.f32 %v1039_v46, %v1038_v44 }
 0x462   :  { %v1057_v50 = vadd.f32 %v1056_v48, %v1055_v47 }
 0x464   :  { %v1058_v52 = vsel %vm435_vm3, %v1040_v49, %v1057_v50 }
 0x465   :  { %2291 = vmatmul.mubr.msk.f32.vlgmr.msra.gmra.mxu0 %vm49_vm0, %v1058_v52 }
 0x466   :  { %2308 = vmatpush3.msra.mxu0 %v2573_v51  ;;  %2311 = vmatprep.mubr.msk.f32.mxu0 %vm2457_vm2, %v2456_v22 }
 0x467   :  { %2309 = vmatprep.subr.mxu0 %v2456_v22 }
 0x468   :  { %2310 = vmatpush3.msra.mxu0 %v2577_v53 }
 0x469   :  { %2312 = vmatmul.mubr.f32.vlgmr.msra.gmra.mxu0 %v2456_v22  ;;  %2314 = vmatprep.subr.mxu0 %v2456_v22 }
 0x46a   :  { %2315 = vmatpush3.msra.mxu0 %v2573_v51  ;;  %2318 = vmatprep.mubr.msk.f32.mxu0 %vm2457_vm2, %v2456_v22 }
 0x46b   :  { %2316 = vmatprep.subr.mxu0 %v2456_v22 }
 0x46c   :  { %2317 = vmatpush3.msra.mxu0 %v2577_v53 }
 0x46d   :  { %2321 = vmatprep.subr.mxu0 %v2456_v22 }
 0x525   :  { %v1132_v58 = vpop.f32.mrf.mxu0 }
 0x526   :  { %v1136_v59 = vmul.f32 0.03125, %v1132_v58 }
 0x527   :  { %v2292_v60 = vpop.f32.mrf.mxu0 }
 0x528   :  { %v1145_v61 = vmul.f32 %v1136_v59, %v1136_v59  ;;  %v1140_v11 = vrot.slane %v1136_v59, %v517_v5 }
 0x529   :  { %v1360_v63 = vpop.f32.mrf.mxu0 }
 0x52a   :  { %v1147_v0 = vrot.slane %v1145_v61, 7  ;;  %v1361_v1 = vadd.f32 %v2593_v62, %v1360_v63  ;;  %v1142_v15 = vsub.f32 %v2545_v10, %v1140_v11  ;;  %v1141_v17 = vsub.f32 %v2547_v12, %v1140_v11  ;;  %v2615_v12 = vld [vmem:[#allocation4 + $0x1a0] ss:$0 sm:$0xff] }
 0x52b   :  { %v2313_v2 = vpop.f32.mrf.mxu0  ;;  %v1143_v18 = vsub.f32 %v2560_v25, %v1140_v11  ;;  %v1144_v21 = vsub.f32 %v2555_v19, %v1140_v11 }
 0x52c   :  { %v1149_v4 = vsub.f32 %v1136_v59, %v1147_v0  ;;  %1370 = vrot.lane.b32.xlu0 %v1361_v1, %s2458_s0 }
 0x52e   :  { %v1150_v6 = vadd.f32 1e-05, %v1149_v4 }
 0x530   :  { %2386 = vrsqrt.f32 %v1150_v6 }
 0x53d   :  { %v2387_v13 = vpop.eup %2386 }
 0x53e   :  { %v1156_v14 = vmul.f32 %v2387_v13, %v1154_v9 }
 0x540   :  { %v1160_v16 = vrot.slane %v1156_v14, %v535_v8 }
 0x542   :  { %v1162_v23 = vmul.f32 %v1160_v16, %v1142_v15  ;;  %v1161_v24 = vmul.f32 %v1160_v16, %v1141_v17  ;;  %v1163_v26 = vmul.f32 %v1160_v16, %v1143_v18  ;;  %v1164_v27 = vmul.f32 %v1160_v16, %v1144_v21 }
 0x544   :  { %v1170_v28 = vadd.f32 %v2047_v20, %v1161_v24  ;;  %v1171_v5 = vadd.f32 %v2047_v20, %v1162_v23  ;;  %v1172_v29 = vadd.f32 %v2047_v20, %v1163_v26  ;;  %v1173_v10 = vadd.f32 %v2047_v20, %v1164_v27 }
 0x546   :  { %v1174_v30 = vmax.f32 %v1170_v28, 0.0  ;;  %v1175_v31 = vmax.f32 %v1171_v5, 0.0  ;;  %v1176_v3 = vmax.f32 %v1172_v29, 0.0  ;;  %v1177_v8 = vmax.f32 %v1173_v10, 0.0 }
 0x548   :  { %2301 = vmatprep.mubr.msk.f32.mxu1 %vm49_vm0, %v1174_v30 }
 0x549   :  { %2302 = vmatmul.mubr.msk.f32.vlgmr.msra.gmra.mxu1 %vm49_vm0, %v1175_v31 }
 0x54a   :  { %2304 = vmatprep.mubr.msk.f32.mxu1 %vm49_vm0, %v1176_v3  ;;  %2329 = vmatpush3.msra.mxu1 %v2573_v51 }
 0x54b   :  { %2330 = vmatprep.subr.mxu1 %v2456_v22 }
 0x54c   :  { %2331 = vmatpush3.msra.mxu1 %v2577_v53 }
 0x54d   :  { %2305 = vmatmul.mubr.msk.f32.gmra.mxu1 %vm49_vm0, %v1177_v8  ;;  %2342 = vmatprep.subr.mxu1 %v2456_v22 }
 0x54e   :  { %2332 = vmatprep.mubr.msk.f32.mxu1 %vm2457_vm2, %v2456_v22 }
 0x59e   :  { %v1371_v40 = vpop.permute.xlu0 %1370 }
 0x609   :  { %v2303_v19 = vpop.f32.mrf.mxu1 }
 0x60a   :  { %v1271_v25 = vadd.f32 %v2303_v19, %v2615_v12 }
 0x60b   :  { %v1265_v32 = vpop.f32.mrf.mxu1 }
 0x60c   :  { %v1266_v33 = vadd.f32 %v2615_v12, %v1265_v32 }
 0x60d   :  { %v2306_v34 = vpop.f32.mrf.mxu1 }
 0x60e   :  { %v1364_v35 = vadd.f32 %v1361_v1, %v1266_v33  ;;  %v2620_v36 = vadd.f32 %v2306_v34, %v2615_v12 }
 0x60f   :  { %v1275_v16 = vpop.f32.mrf.mxu1 }
 0x610   :  { %v1365_v37 = vmul.f32 0.5, %v1364_v35  ;;  %v1276_v17 = vadd.f32 %v2615_v12, %v1275_v16 }
 0x612   :  { %2388 = vtanh.f32 %v1365_v37 }
 0x61f   :  { %v2389_v38 = vpop.eup %2388 }
 0x620   :  { %v1367_v39 = vadd.f32 1.0, %v2389_v38 }
 0x622   :  { %v1368_v41 = vmul.f32 0.5, %v1367_v39 }
 0x624   :  { %v1373_v42 = vmul.f32 %v1371_v40, %v1368_v41  ;;  %v1380_v46 = vsub.f32 1.0, %v1368_v41  ;;  %v1386_v48 = vmul.f32 0.0, %v1368_v41 }
 0x626   :  { %1375 = vrot.lane.b32.xlu0 %v1373_v42, %s2459_s1 }
 0x698   :  { %v1376_v43 = vpop.permute.xlu0 %1375 }
 0x699   :  { %v1378_v44 = vadd.f32 %v1376_v43, %v1266_v33  ;;  %v1686_v43 = vld [vmem:[#allocation4 + $0x1c8] sm:$0xff] }
 0x69b   :  { %2390 = vtanh.f32 %v1378_v44 }
 0x6a8   :  { %v2391_v45 = vpop.eup %2390 }
 0x6a9   :  { %1382 = vrot.lane.b32.xlu1 %v2391_v45, %s2460_s21  ;;  %v1765_v45 = vld [vmem:[#allocation4 + $0x1e8] sm:$0xff] }
 0x71b   :  { %v1383_v47 = vpop.permute.xlu1 %1382 }
 0x71c   :  { %v1385_v49 = vmul.f32 %v1383_v47, %v1380_v46  ;;  %v1764_v46 = vld [vmem:[#allocation4 + $0x1e0] sm:$0xff]  ;;  %v1763_v47 = vld [vmem:[#allocation4 + $0x1d8] sm:$0xff] }
 0x71e   :  { %v1387_v50 = vadd.f32 %v1386_v48, %v1385_v49 }
 0x720   :  { %1389 = vrot.lane.b32.xlu1 %v1387_v50, %s2460_s21 }
 0x792   :  { %v1390_v52 = vpop.permute.xlu1 %1389 }
 0x793   :  { %2319 = vmatmul.mubr.msk.f32.vlgmr.msra.gmra.mxu0 %vm169_vm1, %v1390_v52 }
 0x794   :  { %2322 = vmatpush3.msra.mxu0 %v2573_v51  ;;  %2325 = vmatprep.mubr.msk.f32.mxu0 %vm2457_vm2, %v2456_v22 }
 0x795   :  { %2323 = vmatprep.subr.mxu0 %v2456_v22 }
 0x796   :  { %2324 = vmatpush3.msra.mxu0 %v2577_v53 }
 0x797   :  { %2335 = vmatprep.subr.mxu0 %v2456_v22 }
 0x853   :  { %v1459_v54 = vpop.f32.mrf.mxu0 }
 0x854   :  { %v1460_v55 = vadd.f32 %v2593_v62, %v1459_v54 }
 0x855   :  { %v2320_v56 = vpop.f32.mrf.mxu0 }
 0x856   :  { %1469 = vrot.lane.b32.xlu0 %v1460_v55, %s2458_s0  ;;  %v1463_v57 = vadd.f32 %v1460_v55, %v1271_v25  ;;  %v1762_v55 = vld [vmem:[#allocation4 + $0x1d0] sm:$0xff] }
 0x858   :  { %v1464_v58 = vmul.f32 0.5, %v1463_v57 }
 0x85a   :  { %2392 = vtanh.f32 %v1464_v58 }
 0x867   :  { %v2393_v59 = vpop.eup %2392 }
 0x868   :  { %v1466_v51 = vadd.f32 1.0, %v2393_v59 }
 0x86a   :  { %v1467_v60 = vmul.f32 0.5, %v1466_v51 }
 0x86c   :  { %v1479_v2 = vsub.f32 1.0, %v1467_v60  ;;  %v1485_v6 = vmul.f32 %v1467_v60, %v1387_v50 }
 0x8c8   :  { %v1470_v61 = vpop.permute.xlu0 %1469 }
 0x8c9   :  { %v1472_v63 = vmul.f32 %v1470_v61, %v1467_v60  ;;  %v1848_v60 = vld [vmem:[#allocation4 + $0x228] sm:$0xff]  ;;  %v1847_v61 = vld [vmem:[#allocation4 + $0x220] sm:$0xff] }
 0x8cb   :  { %1474 = vrot.lane.b32.xlu1 %v1472_v63, %s2459_s1  ;;  %v1846_v63 = vld [vmem:[#allocation4 + $0x218] sm:$0xff] }
 0x93d   :  { %v1475_v0 = vpop.permute.xlu1 %1474 }
 0x93e   :  { %v1477_v53 = vadd.f32 %v1475_v0, %v1271_v25  ;;  %v1845_v0 = vld [vmem:[#allocation4 + $0x210] sm:$0xff] }
 0x940   :  { %2394 = vtanh.f32 %v1477_v53 }
 0x94d   :  { %v2395_v1 = vpop.eup %2394 }
 0x94e   :  { %1481 = vrot.lane.b32.xlu0 %v2395_v1, %s2460_s21 }
 0x9c0   :  { %v1482_v4 = vpop.permute.xlu0 %1481 }
 0x9c1   :  { %v1484_v7 = vmul.f32 %v1482_v4, %v1479_v2 }
 0x9c3   :  { %v1486_v9 = vadd.f32 %v1485_v6, %v1484_v7  ;;  %v1927_v6 = vld [vmem:[#allocation4 + $0x208] sm:$0xff]  ;;  %v1926_v7 = vld [vmem:[#allocation4 + $0x200] sm:$0xff] }
 0x9c5   :  { %1488 = vrot.lane.b32.xlu1 %v1486_v9, %s2460_s21 }
 0xa37   :  { %v1489_v11 = vpop.permute.xlu1 %1488 }
 0xa38   :  { %2326 = vmatmul.mubr.msk.f32.vlgmr.msra.gmra.mxu0 %vm169_vm1, %v1489_v11  ;;  %v1924_v11 = vld [vmem:[#allocation4 + $0x1f0] sm:$0xff] }
 0xa39   :  { %2339 = vmatprep.mubr.msk.f32.mxu0 %vm2457_vm2, %v2456_v22  ;;  %2336 = vmatpush3.msra.mxu0 %v1686_v43 }
 0xa3a   :  { %2337 = vmatprep.subr.mxu0 %v2456_v22 }
 0xaf8   :  { %v1558_v13 = vpop.f32.mrf.mxu0 }
 0xaf9   :  { %v1559_v14 = vadd.f32 %v2593_v62, %v1558_v13 }
 0xafa   :  { %v2327_v15 = vpop.f32.mrf.mxu0 }
 0xafb   :  { %1568 = vrot.lane.b32.xlu0 %v1559_v14, %s2458_s0  ;;  %v1562_v18 = vadd.f32 %v1559_v14, %v1276_v17 }
 0xafd   :  { %v1563_v20 = vmul.f32 0.5, %v1562_v18 }
 0xaff   :  { %2396 = vtanh.f32 %v1563_v20 }
 0xb0c   :  { %v2397_v21 = vpop.eup %2396 }
 0xb0d   :  { %v1565_v23 = vadd.f32 1.0, %v2397_v21 }
 0xb0f   :  { %v1566_v24 = vmul.f32 0.5, %v1565_v23 }
 0xb11   :  { %v1578_v30 = vsub.f32 1.0, %v1566_v24  ;;  %v1584_v10 = vmul.f32 %v1566_v24, %v1486_v9  ;;  %v1925_v9 = vld [vmem:[#allocation4 + $0x1f8] sm:$0xff] }
 0xb6d   :  { %v1569_v26 = vpop.permute.xlu0 %1568 }
 0xb6e   :  { %v1571_v27 = vmul.f32 %v1569_v26, %v1566_v24 }
 0xb70   :  { %1573 = vrot.lane.b32.xlu1 %v1571_v27, %s2459_s1 }
 0xbe2   :  { %v1574_v28 = vpop.permute.xlu1 %1573 }
 0xbe3   :  { %v1576_v5 = vadd.f32 %v1574_v28, %v1276_v17 }
 0xbe5   :  { %2398 = vtanh.f32 %v1576_v5 }
 0xbf2   :  { %v2399_v29 = vpop.eup %2398 }
 0xbf3   :  { %1580 = vrot.lane.b32.xlu0 %v2399_v29, %s2460_s21 }
 0xc65   :  { %v1581_v31 = vpop.permute.xlu0 %1580 }
 0xc66   :  { %v1583_v3 = vmul.f32 %v1581_v31, %v1578_v30 }
 0xc68   :  { %v1585_v8 = vadd.f32 %v1584_v10, %v1583_v3 }
 0xc6a   :  { %1587 = vrot.lane.b32.xlu1 %v1585_v8, %s2460_s21 }
 0xcdc   :  { %v1588_v12 = vpop.permute.xlu1 %1587 }
 0xcdd   :  { %2333 = vmatmul.mubr.msk.f32.vlgmr.msra.gmra.mxu1 %vm169_vm1, %v1588_v12 }
 0xcde   :  { %2350 = vmatprep.mubr.msk.f32.mxu1 %vm2457_vm2, %v2456_v22  ;;  %2343 = vmatpush3.msra.mxu1 %v1765_v45 }
 0xcdf   :  { %2344 = vmatprep.subr.mxu1 %v2456_v22 }
 0xce0   :  { %2345 = vmatpush3.msra.mxu1 %v1764_v46 }
 0xce1   :  { %2346 = vmatprep.subr.mxu1 %v2456_v22 }
 0xce2   :  { %2347 = vmatpush3.msra.mxu1 %v1763_v47 }
 0xce3   :  { %2348 = vmatprep.subr.mxu1 %v2456_v22 }
 0xce4   :  { %2349 = vmatpush3.msra.mxu1 %v1762_v55 }
 0xce5   :  { %2364 = vmatprep.subr.mxu1 %v2456_v22 }
 0xd9d   :  { %v1657_v19 = vpop.f32.mrf.mxu1 }
 0xd9e   :  { %v1658_v25 = vadd.f32 %v2593_v62, %v1657_v19  ;;  %v1685_v62 = vld [vmem:[#allocation4 + $0x1c0] sm:$0xff] }
 0xd9f   :  { %v2334_v32 = vpop.f32.mrf.mxu1  ;;  %2338 = vmatpush3.msra.mxu0 %v1685_v62 }
 0xda0   :  { %1667 = vrot.lane.b32.xlu0 %v1658_v25, %s2458_s0  ;;  %v1661_v33 = vadd.f32 %v1658_v25, %v2620_v36  ;;  %2353 = vmatprep.subr.mxu0 %v2456_v22 }
 0xda2   :  { %v1662_v34 = vmul.f32 0.5, %v1661_v33 }
 0xda4   :  { %2400 = vtanh.f32 %v1662_v34 }
 0xdb1   :  { %v2401_v35 = vpop.eup %2400 }
 0xdb2   :  { %v1664_v37 = vadd.f32 1.0, %v2401_v35 }
 0xdb4   :  { %v1665_v38 = vmul.f32 0.5, %v1664_v37 }
 0xdb6   :  { %v1683_v49 = vmul.f32 %v1665_v38, %v1585_v8 }
 0xe12   :  { %v1668_v39 = vpop.permute.xlu0 %1667 }
 0xe13   :  { %v1670_v40 = vmul.f32 %v1668_v39, %v1665_v38 }
 0xe15   :  { %1672 = vrot.lane.b32.xlu1 %v1670_v40, %s2459_s1 }
 0xe87   :  { %v1673_v41 = vpop.permute.xlu1 %1672 }
 0xe88   :  { %v1675_v42 = vadd.f32 %v1673_v41, %v2620_v36  ;;  %v1677_v36 = vsub.f32 1.0, %v1665_v38 }
 0xe8a   :  { %2402 = vtanh.f32 %v1675_v42 }
 0xe97   :  { %v2403_v44 = vpop.eup %2402 }
 0xe98   :  { %1679 = vrot.lane.b32.xlu0 %v2403_v44, %s2460_s21 }
 0xf0a   :  { %v1680_v48 = vpop.permute.xlu0 %1679 }
 0xf0b   :  { %v1682_v50 = vmul.f32 %v1680_v48, %v1677_v36 }
 0xf0d   :  { %v1684_v52 = vadd.f32 %v1683_v49, %v1682_v50 }
 0xf0f   :  { %1688 = vrot.lane.b32.xlu1 %v1684_v52, %s2460_s21 }
 0xf81   :  { %v1689_v54 = vpop.permute.xlu1 %1688 }
 0xf82   :  { %2340 = vmatmul.mubr.msk.f32.vlgmr.msra.gmra.mxu0 %vm169_vm1, %v1689_v54 }
 0xf83   :  { %2361 = vmatprep.mubr.msk.f32.mxu0 %vm2457_vm2, %v2456_v22  ;;  %2354 = vmatpush3.msra.mxu0 %v1848_v60 }
 0xf84   :  { %2355 = vmatprep.subr.mxu0 %v2456_v22 }
 0xf85   :  { %2356 = vmatpush3.msra.mxu0 %v1847_v61 }
 0xf86   :  { %2357 = vmatprep.subr.mxu0 %v2456_v22 }
 0xf87   :  { %2358 = vmatpush3.msra.mxu0 %v1846_v63 }
 0xf88   :  { %2359 = vmatprep.subr.mxu0 %v2456_v22 }
 0xf89   :  { %2360 = vmatpush3.msra.mxu0 %v1845_v0 }
0x1042   :  { %v1758_v56 = vpop.f32.mrf.mxu0 }
0x1043   :  { %2351 = vmatmul.mubr.msk.f32.vlgmr.msra.gmra.mxu1 %vm49_vm0, %v1758_v56 }
0x1044   :  { %v2341_v57 = vpop.f32.mrf.mxu0  ;;  %2372 = vmatprep.mubr.msk.f32.mxu1 %vm2457_vm2, %v2456_v22  ;;  %2365 = vmatpush3.msra.mxu1 %v1927_v6 }
0x1045   :  { %2366 = vmatprep.subr.mxu1 %v2456_v22 }
0x1046   :  { %2367 = vmatpush3.msra.mxu1 %v1926_v7 }
0x1047   :  { %2368 = vmatprep.subr.mxu1 %v2456_v22 }
0x1048   :  { %2369 = vmatpush3.msra.mxu1 %v1925_v9 }
0x1049   :  { %2370 = vmatprep.subr.mxu1 %v2456_v22 }
0x104a   :  { %2371 = vmatpush3.msra.mxu1 %v1924_v11 }
0x1103   :  { %v1835_v58 = vpop.f32.mrf.mxu1 }
0x1104   :  { %v1839_v59 = vsel %vm49_vm0, %v1835_v58, -inf }
0x1105   :  { %1840 = vmax.xlane.f32.xlu0 %v1839_v59  ;;  %v2352_v51 = vpop.f32.mrf.mxu1 }
0x118e   :  { %v1841_v53 = vpop.xlane.xlu0 %1840 }
0x118f   :  { %v1842_v1 = vsub.f32 %v1835_v58, %v1841_v53 }
0x1191   :  { %v1843_v2 = vmul.f32 1.442695, %v1842_v1 }
0x1193   :  { %2404 = vpow2.f32 %v1843_v2 }
0x11a0   :  { %v2405_v4 = vpop.eup %2404 }
0x11a1   :  { %2362 = vmatmul.mubr.msk.f32.vlgmr.msra.gmra.mxu0 %vm49_vm0, %v2405_v4 }
0x1261   :  { %v1918_v13 = vpop.f32.mrf.mxu0 }
0x1262   :  { %2406 = vrcp.f32 %v1918_v13 }
0x1263   :  { %v2363_v14 = vpop.f32.mrf.mxu0 }
0x126f   :  { %v2407_v15 = vpop.eup %2406 }
0x1270   :  { %v1923_v16 = vmul.f32 %v2407_v15, %v2405_v4 }
0x1272   :  { %2373 = vmatmul.mubr.msk.f32.vlgmr.msra.gmra.mxu1 %vm49_vm0, %v1923_v16 }
0x1332   :  { %v1997_v17 = vpop.f32.mrf.mxu1 }
0x1333   :  { %2001 = vst.msk [vmem:[%s2683_s2] sm:$0xff] %vm49_vm0, %v1997_v17 }
0x1334   :  { %v2374_v18 = vpop.f32.mrf.mxu1 }
0x1335   :  { %2006 = vsyncpa [#allocation3], 1 }
0x1336   :  { %2007 = vsyncpa [#allocation5], 1 }

</bundles_post_ra>
